<compile_context>
chip_gen: v6e
topology: v6e:2x2x1
jax: 0.10.0
libtpu: 0.0.40
codegen_flags: <defaults>
</compile_context>

<pallas_src>
from functools import partial

import numpy as np
import jax
import jax.numpy as jnp
from jax.experimental import pallas as pl
from jax.experimental.pallas import tpu as pltpu


# ----------------------------- static dimensions -----------------------------

B = 2                    # batch (fold more batch per call for throughput)
H = W = 9                # input spatial (forced by fc1 = 128*2*2)
CIN = 4                  # input channels
K1, C1 = 5, 24           # conv1: 5x5 kernel, 24 out channels
OH1 = H - K1 + 1         # 5
K2, C2 = 2, 128          # conv2: 2x2 kernel, 128 out channels
OH2 = OH1 - K2 + 1       # 4
PH = PW = 2              # pooled spatial
FC1_IN = C2 * PH * PW    # 512
FC1_OUT = 96
LANE = 128               # lane-dense padding width
NROW = B * H             # 18 rows: (b, h)
XROWS = 24               # input rows zero-padded so kh-offset loads stay in bounds


# ------------------------------- fused kernel --------------------------------

def _fused_cnn_kernel(x_ref, w1_ref, b1_ref, w2_ref, b2_ref,
                      wf1_ref, bf1_ref, wf2_ref, bf2_ref,
                      s1_ref, g0_ref, g1_ref, o_ref):
    f32 = jnp.float32

    # ---- conv1: 5 accumulated tap matmuls.  Rows = (b, oh); lanes = (ow, c1).
    # kh tap -> row-offset load of the padded input; kw window folded into the
    # block-Toeplitz weight slab w1_ref[kh] of shape (W*CIN, 128).
    acc1 = jnp.dot(x_ref[0:NROW, :], w1_ref[0], preferred_element_type=f32)
    for kh in range(1, K1):
        acc1 = acc1 + jnp.dot(x_ref[kh:kh + NROW, :], w1_ref[kh],
                              preferred_element_type=f32)
    y1 = jnp.maximum(acc1 + b1_ref[...], 0.0)                    # (18, 128)

    # ---- conv2: 2 accumulated tap matmuls.  Rows = (b, ho); lanes = (wo, c2).
    # The di=1 row shift is a constant shift-matrix matmul (MXU, no shuffles).
    s1 = s1_ref[...]                                             # (18, 18)
    y1_dn = jnp.dot(s1, y1, preferred_element_type=f32)          # y1_dn[p] = y1[p+1]
    acc2 = jnp.dot(y1, w2_ref[0], preferred_element_type=f32)
    acc2 = acc2 + jnp.dot(y1_dn, w2_ref[1], preferred_element_type=f32)
    y2 = jnp.maximum(acc2 + b2_ref[...], 0.0)                    # (18, 512)

    # ---- 2x2 maxpool fused with fc1 ----
    # dh-max: whole-tile max against the one-row-shifted activation.
    m1 = jnp.maximum(y2, jnp.dot(s1, y2, preferred_element_type=f32))
    acc_h = None
    for hp, g_ref in ((0, g0_ref), (1, g1_ref)):
        # row gather (b, hp) -> (B, 512) via a constant selection matmul.
        g = jnp.dot(g_ref[...], m1, preferred_element_type=f32)
        for wp in range(PW):
            # dw-max over two 128-lane-aligned blocks (cheap vreg selects).
            blk = jnp.maximum(g[:, (2 * wp) * C2:(2 * wp + 1) * C2],
                              g[:, (2 * wp + 1) * C2:(2 * wp + 2) * C2])   # (B,128)
            part = jnp.dot(blk, wf1_ref[hp * PW + wp], preferred_element_type=f32)
            acc_h = part if acc_h is None else acc_h + part
    h = jnp.maximum(acc_h + bf1_ref[...], 0.0)                   # (B, 128), valid :96

    # ---- fc2 (lane-padded output; sliced to num_class outside the kernel) ----
    out = jnp.dot(h, wf2_ref[...], preferred_element_type=f32) + bf2_ref[...]
    o_ref[...] = out.astype(o_ref.dtype)


# --------------------------- one-time weight prep -----------------------------

def prepare_params(params, num_class):
    """Host-side one-time weight re-layout (Toeplitz expansion, permutation,
    lane padding, constant shift/selection operators)."""
    f32 = np.float32
    w1 = np.asarray(params["w1"], f32)    # (24, 4, 5, 5)
    b1 = np.asarray(params["b1"], f32)
    w2 = np.asarray(params["w2"], f32)    # (128, 24, 2, 2)
    b2 = np.asarray(params["b2"], f32)
    wf1 = np.asarray(params["wf1"], f32)  # (96, 512)
    bf1 = np.asarray(params["bf1"], f32)
    wf2 = np.asarray(params["wf2"], f32)  # (num_class, 96)
    bf2 = np.asarray(params["bf2"], f32)

    # conv1: per-kh block-Toeplitz slab (W*CIN, 128); lanes = (ow, c1).
    w1t = np.zeros((K1, W * CIN, LANE), f32)
    for kh in range(K1):
        for ow in range(OH1):
            for kw in range(K1):
                w_ = ow + kw
                w1t[kh, w_ * CIN:(w_ + 1) * CIN, ow * C1:ow * C1 + C1] = w1[:, :, kh, kw].T
    b1w = np.zeros((1, LANE), f32)
    b1w[0, :OH1 * C1] = np.tile(b1, OH1)

    # conv2: per-di block-Toeplitz slab (128, 512); rows = (ow1, c1), lanes = (wo, c2).
    w2t = np.zeros((K2, LANE, OH2 * C2), f32)
    for di in range(K2):
        for wo in range(OH2):
            for dj in range(K2):
                ow1 = wo + dj
                w2t[di, ow1 * C1:(ow1 + 1) * C1, wo * C2:(wo + 1) * C2] = w2[:, :, di, dj].T
    b2w = np.tile(b2, OH2).reshape(1, OH2 * C2).astype(f32)

    # fc1: torch flattens pooled (c2, hp, wp); kernel feature order is (hp, wp, c2).
    # Split into 4 (128,128) blocks indexed by hp*PW + wp, lane-padded to 128 outs.
    wf1m = wf1.reshape(FC1_OUT, C2, PH, PW).transpose(2, 3, 1, 0).reshape(PH * PW, C2, FC1_OUT)
    wf1p = np.zeros((PH * PW, C2, LANE), f32)
    wf1p[:, :, :FC1_OUT] = wf1m
    bf1p = np.zeros((1, LANE), f32)
    bf1p[0, :FC1_OUT] = bf1

    # fc2: (96, nc) -> (128, 128) zero-padded (padded rows/cols contribute 0).
    wf2p = np.zeros((LANE, LANE), f32)
    wf2p[:FC1_OUT, :num_class] = wf2.T
    bf2p = np.zeros((1, LANE), f32)
    bf2p[0, :num_class] = bf2

    # Constant operators (run on the MXU; avoid sublane shuffles / masked stores):
    # s1: shift-up-by-one over the (b, h) row grid; g0/g1: pooled-row selectors.
    s1 = np.eye(NROW, NROW, 1, dtype=f32)                 # (18, 18)
    g0 = np.zeros((B, NROW), f32)
    g1 = np.zeros((B, NROW), f32)
    for b in range(B):
        g0[b, b * H + 0] = 1.0                            # hp = 0 -> conv2 row ho=0
        g1[b, b * H + 2] = 1.0                            # hp = 1 -> conv2 row ho=2

    return tuple(jnp.asarray(a) for a in
                 (w1t, b1w, w2t, b2w, wf1p, bf1p, wf2p, bf2p, s1, g0, g1))


# -------------------------------- forward pass --------------------------------

@partial(jax.jit, static_argnames=("num_class",))
def cnn_forward(x_nchw, prepped, num_class):
    (w1t, b1w, w2t, b2w, wf1p, bf1p, wf2p, bf2p, s1, g0, g1) = prepped
    assert x_nchw.shape == (B, CIN, H, W)

    # Only XLA glue: NCHW -> (b*h, w*c) relayout + zero row-pad of the tiny input
    # (pure layout plumbing; lets the kernel load kh-offset windows in-bounds).
    x2 = jnp.transpose(x_nchw, (0, 2, 3, 1)).reshape(NROW, W * CIN).astype(jnp.float32)
    x2 = jnp.pad(x2, ((0, XROWS - NROW), (0, 0)))

    args = (x2, w1t, b1w, w2t, b2w, wf1p, bf1p, wf2p, bf2p, s1, g0, g1)

    def vspec(a):
        nd = a.ndim
        return pl.BlockSpec(a.shape, lambda i, _nd=nd: (0,) * _nd)

    out_pad = pl.pallas_call(
        _fused_cnn_kernel,
        out_shape=jax.ShapeDtypeStruct((B, LANE), jnp.float32),
        grid=(1,),
        in_specs=[vspec(a) for a in args],
        out_specs=pl.BlockSpec((B, LANE), lambda i: (0, 0)),
        compiler_params=pltpu.CompilerParams(
            dimension_semantics=("arbitrary",),
            vmem_limit_bytes=8 * 1024 * 1024,
        ),
    )(*args)
    return out_pad[:, :num_class]


# ------------------------------ JAX reference ---------------------------------

def cnn_reference(x_nchw, params):
    def conv(x, w, b):
        y = jax.lax.conv_general_dilated(
            x, w, window_strides=(1, 1), padding="VALID",
            dimension_numbers=("NCHW", "OIHW", "NCHW"))
        return y + b[None, :, None, None]

    x = jax.nn.relu(conv(x_nchw, params["w1"], params["b1"]))
    x = jax.nn.relu(conv(x, params["w2"], params["b2"]))
    x = jax.lax.reduce_window(x, -jnp.inf, jax.lax.max,
                              (1, 1, 2, 2), (1, 1, 2, 2), "VALID")
    x = x.reshape(x.shape[0], -1)
    x = jax.nn.relu(x @ params["wf1"].T + params["bf1"])
    x = x @ params["wf2"].T + params["bf2"]
    return x


# ----------------------------------- main --------------------------------------

if __name__ == "__main__":
    num_class = 10
    key = jax.random.PRNGKey(0)
    keys = jax.random.split(key, 9)

    params = {
        "w1": 0.1 * jax.random.normal(keys[0], (24, 4, 5, 5), jnp.float32),
        "b1": 0.1 * jax.random.normal(keys[1], (24,), jnp.float32),
        "w2": 0.05 * jax.random.normal(keys[2], (128, 24, 2, 2), jnp.float32),
        "b2": 0.1 * jax.random.normal(keys[3], (128,), jnp.float32),
        "wf1": 0.05 * jax.random.normal(keys[4], (96, 512), jnp.float32),
        "bf1": 0.1 * jax.random.normal(keys[5], (96,), jnp.float32),
        "wf2": 0.05 * jax.random.normal(keys[6], (num_class, 96), jnp.float32),
        "bf2": 0.1 * jax.random.normal(keys[7], (num_class,), jnp.float32),
    }

    prepped = prepare_params(params, num_class)

    # Input must be (B, 4, 9, 9) so that fc1 sees 128*2*2 features.
    x = jax.random.normal(keys[8], (B, CIN, H, W), jnp.float32)

    out = jax.block_until_ready(cnn_forward(x, prepped, num_class))
    assert out.shape == (B, num_class)

    ref = jax.block_until_ready(cnn_reference(x, params))
    assert jnp.allclose(out, ref, atol=5e-4, rtol=5e-4), "mismatch vs JAX reference"

    print("KERNEL_OK")
</pallas_src>

<mosaic_0001>
module attributes {stable_mosaic.version = 11 : i64} {
  func.func @_fused_cnn_kernel(%arg0: i32, %arg1: memref<24x36xf32, #tpu.memory_space<vmem>>, %arg2: memref<5x36x128xf32, #tpu.memory_space<vmem>>, %arg3: memref<1x128xf32, #tpu.memory_space<vmem>>, %arg4: memref<2x128x512xf32, #tpu.memory_space<vmem>>, %arg5: memref<1x512xf32, #tpu.memory_space<vmem>>, %arg6: memref<4x128x128xf32, #tpu.memory_space<vmem>>, %arg7: memref<1x128xf32, #tpu.memory_space<vmem>>, %arg8: memref<128x128xf32, #tpu.memory_space<vmem>>, %arg9: memref<1x128xf32, #tpu.memory_space<vmem>>, %arg10: memref<18x18xf32, #tpu.memory_space<vmem>>, %arg11: memref<2x18xf32, #tpu.memory_space<vmem>>, %arg12: memref<2x18xf32, #tpu.memory_space<vmem>>, %arg13: memref<2x128xf32, #tpu.memory_space<vmem>>) attributes {dimension_semantics = [#tpu.dimension_semantics<arbitrary>], iteration_bounds = array<i64: 1>, scalar_prefetch = 0 : i64, scratch_operands = 0 : i64, tpu.core_type = #tpu.core_type<tc>, window_params = [{pipeline_mode = #tpu.pipeline_mode<synchronous>, transform_indices = @transform_0, window_bounds = array<i64: 24, 36>}, {pipeline_mode = #tpu.pipeline_mode<synchronous>, transform_indices = @transform_1, window_bounds = array<i64: 5, 36, 128>}, {pipeline_mode = #tpu.pipeline_mode<synchronous>, transform_indices = @transform_2, window_bounds = array<i64: 1, 128>}, {pipeline_mode = #tpu.pipeline_mode<synchronous>, transform_indices = @transform_3, window_bounds = array<i64: 2, 128, 512>}, {pipeline_mode = #tpu.pipeline_mode<synchronous>, transform_indices = @transform_4, window_bounds = array<i64: 1, 512>}, {pipeline_mode = #tpu.pipeline_mode<synchronous>, transform_indices = @transform_5, window_bounds = array<i64: 4, 128, 128>}, {pipeline_mode = #tpu.pipeline_mode<synchronous>, transform_indices = @transform_6, window_bounds = array<i64: 1, 128>}, {pipeline_mode = #tpu.pipeline_mode<synchronous>, transform_indices = @transform_7, window_bounds = array<i64: 128, 128>}, {pipeline_mode = #tpu.pipeline_mode<synchronous>, transform_indices = @transform_8, window_bounds = array<i64: 1, 128>}, {pipeline_mode = #tpu.pipeline_mode<synchronous>, transform_indices = @transform_9, window_bounds = array<i64: 18, 18>}, {pipeline_mode = #tpu.pipeline_mode<synchronous>, transform_indices = @transform_10, window_bounds = array<i64: 2, 18>}, {pipeline_mode = #tpu.pipeline_mode<synchronous>, transform_indices = @transform_11, window_bounds = array<i64: 2, 18>}, {pipeline_mode = #tpu.pipeline_mode<synchronous>, transform_indices = @transform_12, window_bounds = array<i64: 2, 128>}]} {
    %c0 = arith.constant 0 : index
    %c0_0 = arith.constant 0 : index
    %0 = vector.load %arg1[%c0, %c0_0] : memref<24x36xf32, #tpu.memory_space<vmem>>, vector<18x36xf32>
    %c0_1 = arith.constant 0 : index
    %c0_2 = arith.constant 0 : index
    %c0_3 = arith.constant 0 : index
    %1 = vector.load %arg2[%c0_1, %c0_2, %c0_3] : memref<5x36x128xf32, #tpu.memory_space<vmem>>, vector<1x36x128xf32>
    %2 = vector.shape_cast %1 : vector<1x36x128xf32> to vector<36x128xf32>
    %cst = arith.constant dense<0.000000e+00> : vector<18x128xf32>
    %3 = tpu.matmul %0, %2, %cst {dimension_numbers = #tpu.dot_dimension_numbers<[1], [0], [0], [1], [0, 0, 1, 1], [], []>} : vector<18x36xf32>, vector<36x128xf32>, vector<18x128xf32> -> vector<18x128xf32>
    %c1 = arith.constant 1 : index
    %c0_4 = arith.constant 0 : index
    %4 = vector.load %arg1[%c1, %c0_4] : memref<24x36xf32, #tpu.memory_space<vmem>>, vector<18x36xf32>
    %c1_5 = arith.constant 1 : index
    %c0_6 = arith.constant 0 : index
    %c0_7 = arith.constant 0 : index
    %5 = vector.load %arg2[%c1_5, %c0_6, %c0_7] : memref<5x36x128xf32, #tpu.memory_space<vmem>>, vector<1x36x128xf32>
    %6 = vector.shape_cast %5 : vector<1x36x128xf32> to vector<36x128xf32>
    %cst_8 = arith.constant dense<0.000000e+00> : vector<18x128xf32>
    %7 = tpu.matmul %4, %6, %cst_8 {dimension_numbers = #tpu.dot_dimension_numbers<[1], [0], [0], [1], [0, 0, 1, 1], [], []>} : vector<18x36xf32>, vector<36x128xf32>, vector<18x128xf32> -> vector<18x128xf32>
    %8 = arith.addf %3, %7 : vector<18x128xf32>
    %c2 = arith.constant 2 : index
    %c0_9 = arith.constant 0 : index
    %9 = vector.load %arg1[%c2, %c0_9] : memref<24x36xf32, #tpu.memory_space<vmem>>, vector<18x36xf32>
    %c2_10 = arith.constant 2 : index
    %c0_11 = arith.constant 0 : index
    %c0_12 = arith.constant 0 : index
    %10 = vector.load %arg2[%c2_10, %c0_11, %c0_12] : memref<5x36x128xf32, #tpu.memory_space<vmem>>, vector<1x36x128xf32>
    %11 = vector.shape_cast %10 : vector<1x36x128xf32> to vector<36x128xf32>
    %cst_13 = arith.constant dense<0.000000e+00> : vector<18x128xf32>
    %12 = tpu.matmul %9, %11, %cst_13 {dimension_numbers = #tpu.dot_dimension_numbers<[1], [0], [0], [1], [0, 0, 1, 1], [], []>} : vector<18x36xf32>, vector<36x128xf32>, vector<18x128xf32> -> vector<18x128xf32>
    %13 = arith.addf %8, %12 : vector<18x128xf32>
    %c3 = arith.constant 3 : index
    %c0_14 = arith.constant 0 : index
    %14 = vector.load %arg1[%c3, %c0_14] : memref<24x36xf32, #tpu.memory_space<vmem>>, vector<18x36xf32>
    %c3_15 = arith.constant 3 : index
    %c0_16 = arith.constant 0 : index
    %c0_17 = arith.constant 0 : index
    %15 = vector.load %arg2[%c3_15, %c0_16, %c0_17] : memref<5x36x128xf32, #tpu.memory_space<vmem>>, vector<1x36x128xf32>
    %16 = vector.shape_cast %15 : vector<1x36x128xf32> to vector<36x128xf32>
    %cst_18 = arith.constant dense<0.000000e+00> : vector<18x128xf32>
    %17 = tpu.matmul %14, %16, %cst_18 {dimension_numbers = #tpu.dot_dimension_numbers<[1], [0], [0], [1], [0, 0, 1, 1], [], []>} : vector<18x36xf32>, vector<36x128xf32>, vector<18x128xf32> -> vector<18x128xf32>
    %18 = arith.addf %13, %17 : vector<18x128xf32>
    %c4 = arith.constant 4 : index
    %c0_19 = arith.constant 0 : index
    %19 = vector.load %arg1[%c4, %c0_19] : memref<24x36xf32, #tpu.memory_space<vmem>>, vector<18x36xf32>
    %c4_20 = arith.constant 4 : index
    %c0_21 = arith.constant 0 : index
    %c0_22 = arith.constant 0 : index
    %20 = vector.load %arg2[%c4_20, %c0_21, %c0_22] : memref<5x36x128xf32, #tpu.memory_space<vmem>>, vector<1x36x128xf32>
    %21 = vector.shape_cast %20 : vector<1x36x128xf32> to vector<36x128xf32>
    %cst_23 = arith.constant dense<0.000000e+00> : vector<18x128xf32>
    %22 = tpu.matmul %19, %21, %cst_23 {dimension_numbers = #tpu.dot_dimension_numbers<[1], [0], [0], [1], [0, 0, 1, 1], [], []>} : vector<18x36xf32>, vector<36x128xf32>, vector<18x128xf32> -> vector<18x128xf32>
    %23 = arith.addf %18, %22 : vector<18x128xf32>
    %c0_24 = arith.constant 0 : index
    %c0_25 = arith.constant 0 : index
    %24 = vector.load %arg3[%c0_24, %c0_25] : memref<1x128xf32, #tpu.memory_space<vmem>>, vector<1x128xf32>
    %25 = vector.broadcast %24 : vector<1x128xf32> to vector<18x128xf32>
    %26 = arith.addf %23, %25 : vector<18x128xf32>
    %cst_26 = arith.constant 0.000000e+00 : f32
    %27 = vector.broadcast %cst_26 : f32 to vector<18x128xf32>
    %28 = arith.maximumf %26, %27 : vector<18x128xf32>
    %c0_27 = arith.constant 0 : index
    %c0_28 = arith.constant 0 : index
    %29 = vector.load %arg10[%c0_27, %c0_28] : memref<18x18xf32, #tpu.memory_space<vmem>>, vector<18x18xf32>
    %cst_29 = arith.constant dense<0.000000e+00> : vector<18x128xf32>
    %30 = tpu.matmul %29, %28, %cst_29 {dimension_numbers = #tpu.dot_dimension_numbers<[1], [0], [0], [1], [0, 0, 1, 1], [], []>} : vector<18x18xf32>, vector<18x128xf32>, vector<18x128xf32> -> vector<18x128xf32>
    %c0_30 = arith.constant 0 : index
    %c0_31 = arith.constant 0 : index
    %c0_32 = arith.constant 0 : index
    %31 = vector.load %arg4[%c0_30, %c0_31, %c0_32] : memref<2x128x512xf32, #tpu.memory_space<vmem>>, vector<1x128x512xf32>
    %32 = vector.shape_cast %31 : vector<1x128x512xf32> to vector<128x512xf32>
    %cst_33 = arith.constant dense<0.000000e+00> : vector<18x512xf32>
    %33 = tpu.matmul %28, %32, %cst_33 {dimension_numbers = #tpu.dot_dimension_numbers<[1], [0], [0], [1], [0, 0, 1, 1], [], []>} : vector<18x128xf32>, vector<128x512xf32>, vector<18x512xf32> -> vector<18x512xf32>
    %c1_34 = arith.constant 1 : index
    %c0_35 = arith.constant 0 : index
    %c0_36 = arith.constant 0 : index
    %34 = vector.load %arg4[%c1_34, %c0_35, %c0_36] : memref<2x128x512xf32, #tpu.memory_space<vmem>>, vector<1x128x512xf32>
    %35 = vector.shape_cast %34 : vector<1x128x512xf32> to vector<128x512xf32>
    %cst_37 = arith.constant dense<0.000000e+00> : vector<18x512xf32>
    %36 = tpu.matmul %30, %35, %cst_37 {dimension_numbers = #tpu.dot_dimension_numbers<[1], [0], [0], [1], [0, 0, 1, 1], [], []>} : vector<18x128xf32>, vector<128x512xf32>, vector<18x512xf32> -> vector<18x512xf32>
    %37 = arith.addf %33, %36 : vector<18x512xf32>
    %c0_38 = arith.constant 0 : index
    %c0_39 = arith.constant 0 : index
    %38 = vector.load %arg5[%c0_38, %c0_39] : memref<1x512xf32, #tpu.memory_space<vmem>>, vector<1x512xf32>
    %39 = vector.broadcast %38 : vector<1x512xf32> to vector<18x512xf32>
    %40 = arith.addf %37, %39 : vector<18x512xf32>
    %cst_40 = arith.constant 0.000000e+00 : f32
    %41 = vector.broadcast %cst_40 : f32 to vector<18x512xf32>
    %42 = arith.maximumf %40, %41 : vector<18x512xf32>
    %cst_41 = arith.constant dense<0.000000e+00> : vector<18x512xf32>
    %43 = tpu.matmul %29, %42, %cst_41 {dimension_numbers = #tpu.dot_dimension_numbers<[1], [0], [0], [1], [0, 0, 1, 1], [], []>} : vector<18x18xf32>, vector<18x512xf32>, vector<18x512xf32> -> vector<18x512xf32>
    %44 = arith.maximumf %42, %43 : vector<18x512xf32>
    %c0_42 = arith.constant 0 : index
    %c0_43 = arith.constant 0 : index
    %45 = vector.load %arg11[%c0_42, %c0_43] : memref<2x18xf32, #tpu.memory_space<vmem>>, vector<2x18xf32>
    %cst_44 = arith.constant dense<0.000000e+00> : vector<2x512xf32>
    %46 = tpu.matmul %45, %44, %cst_44 {dimension_numbers = #tpu.dot_dimension_numbers<[1], [0], [0], [1], [0, 0, 1, 1], [], []>} : vector<2x18xf32>, vector<18x512xf32>, vector<2x512xf32> -> vector<2x512xf32>
    %47 = vector.extract_strided_slice %46 {offsets = [0, 0], sizes = [2, 128], strides = [1, 1]} : vector<2x512xf32> to vector<2x128xf32>
    %48 = vector.extract_strided_slice %46 {offsets = [0, 128], sizes = [2, 128], strides = [1, 1]} : vector<2x512xf32> to vector<2x128xf32>
    %49 = arith.maximumf %47, %48 : vector<2x128xf32>
    %c0_45 = arith.constant 0 : index
    %c0_46 = arith.constant 0 : index
    %c0_47 = arith.constant 0 : index
    %50 = vector.load %arg6[%c0_45, %c0_46, %c0_47] : memref<4x128x128xf32, #tpu.memory_space<vmem>>, vector<1x128x128xf32>
    %51 = vector.shape_cast %50 : vector<1x128x128xf32> to vector<128x128xf32>
    %cst_48 = arith.constant dense<0.000000e+00> : vector<2x128xf32>
    %52 = tpu.matmul %49, %51, %cst_48 {dimension_numbers = #tpu.dot_dimension_numbers<[1], [0], [0], [1], [0, 0, 1, 1], [], []>} : vector<2x128xf32>, vector<128x128xf32>, vector<2x128xf32> -> vector<2x128xf32>
    %53 = vector.extract_strided_slice %46 {offsets = [0, 256], sizes = [2, 128], strides = [1, 1]} : vector<2x512xf32> to vector<2x128xf32>
    %54 = vector.extract_strided_slice %46 {offsets = [0, 384], sizes = [2, 128], strides = [1, 1]} : vector<2x512xf32> to vector<2x128xf32>
    %55 = arith.maximumf %53, %54 : vector<2x128xf32>
    %c1_49 = arith.constant 1 : index
    %c0_50 = arith.constant 0 : index
    %c0_51 = arith.constant 0 : index
    %56 = vector.load %arg6[%c1_49, %c0_50, %c0_51] : memref<4x128x128xf32, #tpu.memory_space<vmem>>, vector<1x128x128xf32>
    %57 = vector.shape_cast %56 : vector<1x128x128xf32> to vector<128x128xf32>
    %cst_52 = arith.constant dense<0.000000e+00> : vector<2x128xf32>
    %58 = tpu.matmul %55, %57, %cst_52 {dimension_numbers = #tpu.dot_dimension_numbers<[1], [0], [0], [1], [0, 0, 1, 1], [], []>} : vector<2x128xf32>, vector<128x128xf32>, vector<2x128xf32> -> vector<2x128xf32>
    %59 = arith.addf %52, %58 : vector<2x128xf32>
    %c0_53 = arith.constant 0 : index
    %c0_54 = arith.constant 0 : index
    %60 = vector.load %arg12[%c0_53, %c0_54] : memref<2x18xf32, #tpu.memory_space<vmem>>, vector<2x18xf32>
    %cst_55 = arith.constant dense<0.000000e+00> : vector<2x512xf32>
    %61 = tpu.matmul %60, %44, %cst_55 {dimension_numbers = #tpu.dot_dimension_numbers<[1], [0], [0], [1], [0, 0, 1, 1], [], []>} : vector<2x18xf32>, vector<18x512xf32>, vector<2x512xf32> -> vector<2x512xf32>
    %62 = vector.extract_strided_slice %61 {offsets = [0, 0], sizes = [2, 128], strides = [1, 1]} : vector<2x512xf32> to vector<2x128xf32>
    %63 = vector.extract_strided_slice %61 {offsets = [0, 128], sizes = [2, 128], strides = [1, 1]} : vector<2x512xf32> to vector<2x128xf32>
    %64 = arith.maximumf %62, %63 : vector<2x128xf32>
    %c2_56 = arith.constant 2 : index
    %c0_57 = arith.constant 0 : index
    %c0_58 = arith.constant 0 : index
    %65 = vector.load %arg6[%c2_56, %c0_57, %c0_58] : memref<4x128x128xf32, #tpu.memory_space<vmem>>, vector<1x128x128xf32>
    %66 = vector.shape_cast %65 : vector<1x128x128xf32> to vector<128x128xf32>
    %cst_59 = arith.constant dense<0.000000e+00> : vector<2x128xf32>
    %67 = tpu.matmul %64, %66, %cst_59 {dimension_numbers = #tpu.dot_dimension_numbers<[1], [0], [0], [1], [0, 0, 1, 1], [], []>} : vector<2x128xf32>, vector<128x128xf32>, vector<2x128xf32> -> vector<2x128xf32>
    %68 = arith.addf %59, %67 : vector<2x128xf32>
    %69 = vector.extract_strided_slice %61 {offsets = [0, 256], sizes = [2, 128], strides = [1, 1]} : vector<2x512xf32> to vector<2x128xf32>
    %70 = vector.extract_strided_slice %61 {offsets = [0, 384], sizes = [2, 128], strides = [1, 1]} : vector<2x512xf32> to vector<2x128xf32>
    %71 = arith.maximumf %69, %70 : vector<2x128xf32>
    %c3_60 = arith.constant 3 : index
    %c0_61 = arith.constant 0 : index
    %c0_62 = arith.constant 0 : index
    %72 = vector.load %arg6[%c3_60, %c0_61, %c0_62] : memref<4x128x128xf32, #tpu.memory_space<vmem>>, vector<1x128x128xf32>
    %73 = vector.shape_cast %72 : vector<1x128x128xf32> to vector<128x128xf32>
    %cst_63 = arith.constant dense<0.000000e+00> : vector<2x128xf32>
    %74 = tpu.matmul %71, %73, %cst_63 {dimension_numbers = #tpu.dot_dimension_numbers<[1], [0], [0], [1], [0, 0, 1, 1], [], []>} : vector<2x128xf32>, vector<128x128xf32>, vector<2x128xf32> -> vector<2x128xf32>
    %75 = arith.addf %68, %74 : vector<2x128xf32>
    %c0_64 = arith.constant 0 : index
    %c0_65 = arith.constant 0 : index
    %76 = vector.load %arg7[%c0_64, %c0_65] : memref<1x128xf32, #tpu.memory_space<vmem>>, vector<1x128xf32>
    %77 = vector.broadcast %76 : vector<1x128xf32> to vector<2x128xf32>
    %78 = arith.addf %75, %77 : vector<2x128xf32>
    %cst_66 = arith.constant 0.000000e+00 : f32
    %79 = vector.broadcast %cst_66 : f32 to vector<2x128xf32>
    %80 = arith.maximumf %78, %79 : vector<2x128xf32>
    %c0_67 = arith.constant 0 : index
    %c0_68 = arith.constant 0 : index
    %81 = vector.load %arg8[%c0_67, %c0_68] : memref<128x128xf32, #tpu.memory_space<vmem>>, vector<128x128xf32>
    %cst_69 = arith.constant dense<0.000000e+00> : vector<2x128xf32>
    %82 = tpu.matmul %80, %81, %cst_69 {dimension_numbers = #tpu.dot_dimension_numbers<[1], [0], [0], [1], [0, 0, 1, 1], [], []>} : vector<2x128xf32>, vector<128x128xf32>, vector<2x128xf32> -> vector<2x128xf32>
    %c0_70 = arith.constant 0 : index
    %c0_71 = arith.constant 0 : index
    %83 = vector.load %arg9[%c0_70, %c0_71] : memref<1x128xf32, #tpu.memory_space<vmem>>, vector<1x128xf32>
    %84 = vector.broadcast %83 : vector<1x128xf32> to vector<2x128xf32>
    %85 = arith.addf %82, %84 : vector<2x128xf32>
    %c0_72 = arith.constant 0 : index
    %c0_73 = arith.constant 0 : index
    %86 = vector.load %arg13[%c0_72, %c0_73] : memref<2x128xf32, #tpu.memory_space<vmem>>, vector<2x128xf32>
    tpu.vector_store %arg13[%c0_72, %c0_73], %85 {strides = array<i32>} : memref<2x128xf32, #tpu.memory_space<vmem>>, vector<2x128xf32>,
    return
  }
  func.func @transform_0(%arg0: i32) -> (i32, i32) {
    %c0_i32 = arith.constant 0 : i32
    %c0_i32_0 = arith.constant 0 : i32
    %c0_i32_1 = arith.constant 0 : i32
    return %c0_i32, %c0_i32_0 : i32, i32
  }
  func.func @transform_1(%arg0: i32) -> (i32, i32, i32) {
    %c0_i32 = arith.constant 0 : i32
    %c0_i32_0 = arith.constant 0 : i32
    %c0_i32_1 = arith.constant 0 : i32
    %c0_i32_2 = arith.constant 0 : i32
    return %c0_i32, %c0_i32_0, %c0_i32_1 : i32, i32, i32
  }
  func.func @transform_2(%arg0: i32) -> (i32, i32) {
    %c0_i32 = arith.constant 0 : i32
    %c0_i32_0 = arith.constant 0 : i32
    %c0_i32_1 = arith.constant 0 : i32
    return %c0_i32, %c0_i32_0 : i32, i32
  }
  func.func @transform_3(%arg0: i32) -> (i32, i32, i32) {
    %c0_i32 = arith.constant 0 : i32
    %c0_i32_0 = arith.constant 0 : i32
    %c0_i32_1 = arith.constant 0 : i32
    %c0_i32_2 = arith.constant 0 : i32
    return %c0_i32, %c0_i32_0, %c0_i32_1 : i32, i32, i32
  }
  func.func @transform_4(%arg0: i32) -> (i32, i32) {
    %c0_i32 = arith.constant 0 : i32
    %c0_i32_0 = arith.constant 0 : i32
    %c0_i32_1 = arith.constant 0 : i32
    return %c0_i32, %c0_i32_0 : i32, i32
  }
  func.func @transform_5(%arg0: i32) -> (i32, i32, i32) {
    %c0_i32 = arith.constant 0 : i32
    %c0_i32_0 = arith.constant 0 : i32
    %c0_i32_1 = arith.constant 0 : i32
    %c0_i32_2 = arith.constant 0 : i32
    return %c0_i32, %c0_i32_0, %c0_i32_1 : i32, i32, i32
  }
  func.func @transform_6(%arg0: i32) -> (i32, i32) {
    %c0_i32 = arith.constant 0 : i32
    %c0_i32_0 = arith.constant 0 : i32
    %c0_i32_1 = arith.constant 0 : i32
    return %c0_i32, %c0_i32_0 : i32, i32
  }
  func.func @transform_7(%arg0: i32) -> (i32, i32) {
    %c0_i32 = arith.constant 0 : i32
    %c0_i32_0 = arith.constant 0 : i32
    %c0_i32_1 = arith.constant 0 : i32
    return %c0_i32, %c0_i32_0 : i32, i32
  }
  func.func @transform_8(%arg0: i32) -> (i32, i32) {
    %c0_i32 = arith.constant 0 : i32
    %c0_i32_0 = arith.constant 0 : i32
    %c0_i32_1 = arith.constant 0 : i32
    return %c0_i32, %c0_i32_0 : i32, i32
  }
  func.func @transform_9(%arg0: i32) -> (i32, i32) {
    %c0_i32 = arith.constant 0 : i32
    %c0_i32_0 = arith.constant 0 : i32
    %c0_i32_1 = arith.constant 0 : i32
    return %c0_i32, %c0_i32_0 : i32, i32
  }
  func.func @transform_10(%arg0: i32) -> (i32, i32) {
    %c0_i32 = arith.constant 0 : i32
    %c0_i32_0 = arith.constant 0 : i32
    %c0_i32_1 = arith.constant 0 : i32
    return %c0_i32, %c0_i32_0 : i32, i32
  }
  func.func @transform_11(%arg0: i32) -> (i32, i32) {
    %c0_i32 = arith.constant 0 : i32
    %c0_i32_0 = arith.constant 0 : i32
    %c0_i32_1 = arith.constant 0 : i32
    return %c0_i32, %c0_i32_0 : i32, i32
  }
  func.func @transform_12(%arg0: i32) -> (i32, i32) {
    %c0_i32 = arith.constant 0 : i32
    %c0_i32_0 = arith.constant 0 : i32
    %c0_i32_1 = arith.constant 0 : i32
    return %c0_i32, %c0_i32_0 : i32, i32
  }
}

</mosaic_0001>

<bundles_post_ra>
// kernel: cnn_forward.1
= control target key start
LH: loop header
LB: loop body
LE: loop exit
PB: predicated region body
PF: predicated region fallthrough
CT: control target
= control target key end

     0   :  { %17 = vsyncpa [#allocation3], 0  ;;  %s3348_s0 = inlined_call_operand.vmem [shape: f32[24,36], index: 0, kind: input, shape index: {}]   ;;  %s3349_s1 = inlined_call_operand.vmem [shape: f32[5,36,128], index: 1, kind: input, shape index: {}]   ;;  %s3350_s2 = inlined_call_operand.vmem [shape: f32[1,128], index: 2, kind: input, shape index: {}]   ;;  %s3351_s3 = inlined_call_operand.hbm [shape: f32[2,128,512], index: 3, kind: input, shape index: {}]   ;;  %s3352_s4 = inlined_call_operand.vmem [shape: f32[1,512], index: 4, kind: input, shape index: {}]   ;;  %s3353_s5 = inlined_call_operand.hbm [shape: f32[4,128,128], index: 5, kind: input, shape index: {}]   ;;  %s3354_s6 = inlined_call_operand.vmem [shape: f32[1,128], index: 6, kind: input, shape index: {}]   ;;  %s3355_s7 = inlined_call_operand.vmem [shape: f32[128,128], index: 7, kind: input, shape index: {}]   ;;  %s3356_s8 = inlined_call_operand.vmem [shape: f32[1,128], index: 8, kind: input, shape index: {}]   ;;  %s3357_s9 = inlined_call_operand.vmem [shape: f32[18,18], index: 9, kind: input, shape index: {}]   ;;  %s3358_s10 = inlined_call_operand.vmem [shape: f32[2,18], index: 10, kind: input, shape index: {}]   ;;  %s3359_s11 = inlined_call_operand.vmem [shape: f32[2,18], index: 11, kind: input, shape index: {}]   ;;  %s3360_s12 = inlined_call_operand.hbm [shape: f32[2,128], index: 12, kind: output, shape index: {}]  }
   0x1   :  { %18 = vsyncpa [#allocation6], 0 }
   0x2   :  { %19 = vsyncpa [#allocation4], 0  ;;  %s2734_s21 = smov [#allocation2]  }
   0x3   :  { %s31_s22 = sshll.u32 %s2734_s21, 4  ;;  %s32_s22 = int_to_ptr.vmem [resolvable:$true] %s31_s22 }
   0x4   :  { %s2676_s23 = scalar_lea.vmem %s32_s22, 16384  ;;  %p2681_p1 = scmp.lt.s32.totalorder %s32_s22, %s32_s22 }
   0x5   :  { %p2677_p0 = scmp.ne.s32.totalorder %s32_s22, %s2676_s23  ;;  %p2682_p2 = scmp.lt.s32.totalorder %s2676_s23, %s2676_s23 }
   0x7   :  { %p2683_p3 = por %p2682_p2, %p2681_p1 }
   0x9   :  { %p2684_p4 = pnand %p2683_p3, %p2677_p0 }
   0xb   :  { %2687 = shalt.err (!%p2684_p4)
}
   0xc   :  { %s2735_s24 = smov 512   ;;  %s2736_s25 = smov 32  }
   0xd   :  { %37 = dma.hbm_to_vmem [thread:$0]  %s3351_s3, 16384, %s32_s22, [#allocation3], %s2735_s24, %s2735_s24, %s2736_s25  }
   0xe   :  { %s2737_s28 = smov [#allocation5]  }
   0xf   :  { %s45_s29 = sshll.u32 %s2737_s28, 4  ;;  %s46_s29 = int_to_ptr.vmem [resolvable:$true] %s45_s29 }
  0x10   :  { %s2696_s30 = scalar_lea.vmem %s46_s29, 8192  ;;  %p2701_p6 = scmp.lt.s32.totalorder %s46_s29, %s46_s29 }
  0x11   :  { %p2697_p5 = scmp.ne.s32.totalorder %s46_s29, %s2696_s30  ;;  %p2702_p7 = scmp.lt.s32.totalorder %s2696_s30, %s2696_s30 }
  0x13   :  { %p2703_p8 = por %p2702_p7, %p2701_p6 }
  0x15   :  { %p2704_p9 = pnand %p2703_p8, %p2697_p5 }
  0x17   :  { %2707 = shalt.err (!%p2704_p9)
}
  0x18   :  { %s2738_s13 = smov 128   ;;  %s2739_s14 = smov 8  }
  0x19   :  { %51 = dma.hbm_to_vmem [thread:$0]  %s3353_s5, 8192, %s46_s29, [#allocation6], %s2738_s13, %s2738_s13, %s2739_s14  }
  0x1a   :  { %2728 = dma.done.wait [#allocation3], 16384  }
  0x1b   :  { %2729 = vsyncadd [#allocation3], 4294950912 }
  0x1c   :  { %2730 = dma.done.wait [#allocation6], 8192  }
  0x1d   :  { %2731 = vsyncadd [#allocation6], 4294959104  ;;  %v2740_v0 = vmov 0.0   ;;  %vm2741_vm0 = vmmov 0   ;;  %vm97_vm1 = vcmask 1043456   ;;  %v2171_v2 = vld [vmem:[%s3349_s1 + $0x40] sm:$0xff] }
  0x1e   :  { %2368 = vmatprep.subr.mxu1 %v2740_v0  ;;  %2378 = vmatprep.mubr.msk.f32.mxu1 %vm2741_vm0, %v2740_v0  ;;  %v2172_v1 = vld [vmem:[%s3349_s1 + $0x48] sm:$0xf]  ;;  %v2170_v3 = vld [vmem:[%s3349_s1 + $0x38] sm:$0xff]  ;;  %v2185_v4 = vld [vmem:[%s3349_s1 + $0x70] sm:$0xf]  ;;  %vm87_vm2 = vcmask 293888  }
  0x1f   :  { %2406 = vmatprep.subr.mxu0 %v2740_v0  ;;  %2416 = vmatprep.mubr.msk.f32.mxu0 %vm2741_vm0, %v2740_v0  ;;  %v2184_v5 = vld [vmem:[%s3349_s1 + $0x68] sm:$0xff]  ;;  %v2169_v6 = vld [vmem:[%s3349_s1 + $0x30] sm:$0xff]  ;;  %v2183_v7 = vld [vmem:[%s3349_s1 + $0x60] sm:$0xff]  ;;  %vm611_vm3 = vcmask 1041408   ;;  %vm601_vm4 = vcmask 146432   ;;  %s2742_s30 = smov [#allocation7]  }
  0x20   :  { %2369 = vmatpush3.msk.msra.mxu1 %vm97_vm1, %v2172_v1  ;;  %2407 = vmatpush3.msk.msra.mxu0 %vm97_vm1, %v2185_v4  ;;  %v2168_v8 = vld [vmem:[%s3349_s1 + $0x28] sm:$0xff]  ;;  %v2182_v9 = vld [vmem:[%s3349_s1 + $0x58] sm:$0xff]  ;;  %v77_v11 = vld [vmem:[%s3349_s1 + $0x20] sm:$0xf] }
  0x21   :  { %2370 = vmatprep.subr.mxu1 %v2740_v0  ;;  %2408 = vmatprep.subr.mxu0 %v2740_v0  ;;  %v78_v10 = vld [vmem:[%s3348_s0 + $0x1] sm:$0xff]  ;;  %v76_v12 = vld [vmem:[%s3349_s1 + $0x18] sm:$0xff]  ;;  %v2181_v13 = vld [vmem:[%s3349_s1 + $0x50] sm:$0xff] }
  0x22   :  { %2371 = vmatpush3.msra.mxu1 %v2171_v2  ;;  %2409 = vmatpush3.msra.mxu0 %v2184_v5  ;;  %v79_v14 = vld [vmem:[%s3348_s0 + $0x9] sm:$0xff]  ;;  %v80_v18 = vld [vmem:[%s3348_s0 + $0x11] sm:$0x3]  ;;  %v73_v19 = vld [vmem:[%s3349_s1] sm:$0xff] }
  0x23   :  { %2372 = vmatprep.subr.mxu1 %v2740_v0  ;;  %2410 = vmatprep.subr.mxu0 %v2740_v0  ;;  %v75_v15 = vld [vmem:[%s3349_s1 + $0x10] sm:$0xff]  ;;  %v273_v16 = vld [vmem:[%s3348_s0 + $0x2] sm:$0xff]  ;;  %v2194_v23 = vld [vmem:[%s3349_s1 + $0x98] sm:$0xf] }
  0x24   :  { %2373 = vmatpush3.msra.mxu1 %v2170_v3  ;;  %2411 = vmatpush3.msra.mxu0 %v2183_v7  ;;  %v74_v17 = vld [vmem:[%s3349_s1 + $0x8] sm:$0xff]  ;;  %v2203_v20 = vld [vmem:[%s3349_s1 + $0xc0] sm:$0xf]  ;;  %v2193_v24 = vld [vmem:[%s3349_s1 + $0x90] sm:$0xff] }
  0x25   :  { %2374 = vmatprep.subr.mxu1 %v2740_v0  ;;  %2412 = vmatprep.subr.mxu0 %v2740_v0  ;;  %v70_v21 = vld [vmem:[%s3348_s0] sm:$0xff]  ;;  %v274_v22 = vld [vmem:[%s3348_s0 + $0xa] sm:$0xff]  ;;  %v2202_v25 = vld [vmem:[%s3349_s1 + $0xb8] sm:$0xff] }
  0x26   :  { %2375 = vmatpush3.msra.mxu1 %v2169_v6  ;;  %2413 = vmatpush3.msra.mxu0 %v2182_v9  ;;  %v71_v26 = vld [vmem:[%s3348_s0 + $0x8] sm:$0xff]  ;;  %v2201_v28 = vld [vmem:[%s3349_s1 + $0xb0] sm:$0xff]  ;;  %v2191_v31 = vld [vmem:[%s3349_s1 + $0x80] sm:$0xff] }
  0x27   :  { %2376 = vmatprep.subr.mxu1 %v2740_v0  ;;  %2414 = vmatprep.subr.mxu0 %v2740_v0  ;;  %v2192_v27 = vld [vmem:[%s3349_s1 + $0x88] sm:$0xff]  ;;  %v72_v29 = vld [vmem:[%s3348_s0 + $0x10] sm:$0x3]  ;;  %v275_v30 = vld [vmem:[%s3348_s0 + $0x12] sm:$0x3] }
  0x28   :  { %2377 = vmatpush3.msra.mxu1 %v2168_v8  ;;  %2415 = vmatpush3.msra.mxu0 %v2181_v13  ;;  %v2200_v32 = vld [vmem:[%s3349_s1 + $0xa8] sm:$0xff]  ;;  %v2190_v33 = vld [vmem:[%s3349_s1 + $0x78] sm:$0xff]  ;;  %v2199_v34 = vld [vmem:[%s3349_s1 + $0xa0] sm:$0xff] }
  0x29   :  { %2379 = vmatmul.mubr.msk.f32.vlgmr.msra.gmra.mxu1 %vm87_vm2, %v78_v10  ;;  %2387 = vmatprep.subr.mxu1 %v2740_v0  ;;  %v377_v35 = vld [vmem:[%s3348_s0 + $0x3] sm:$0xff]  ;;  %v378_v37 = vld [vmem:[%s3348_s0 + $0xb] sm:$0xff]  ;;  %v379_v39 = vld [vmem:[%s3348_s0 + $0x13] sm:$0x3] }
  0x2a   :  { %2381 = vmatprep.mubr.msk.f32.mxu1 %vm2741_vm0, %v2740_v0  ;;  %2388 = vmatpush3.msk.msra.mxu1 %vm97_vm1, %v77_v11  ;;  %v481_v36 = vld [vmem:[%s3348_s0 + $0x4] sm:$0xff]  ;;  %v482_v38 = vld [vmem:[%s3348_s0 + $0xc] sm:$0xff]  ;;  %v483_v40 = vld [vmem:[%s3348_s0 + $0x14] sm:$0x3] }
  0x2b   :  { %2389 = vmatprep.subr.mxu1 %v2740_v0  ;;  %2417 = vmatmul.mubr.msk.f32.vlgmr.msra.gmra.mxu0 %vm87_vm2, %v273_v16  ;;  %v821_v41 = vld [vmem:[#allocation2 + $0x3e8] sm:$0xff]  ;;  %v820_v42 = vld [vmem:[#allocation2 + $0x3e0] sm:$0xff] }
  0x2c   :  { %2390 = vmatpush3.msra.mxu1 %v76_v12  ;;  %2444 = vmatprep.subr.mxu0 %v2740_v0  ;;  %v817_v43 = vld [vmem:[#allocation2 + $0x3c8] sm:$0xff]  ;;  %v816_v44 = vld [vmem:[#allocation2 + $0x3c0] sm:$0xff] }
  0x2d   :  { %2382 = vmatmul.mubr.msk.f32.gmra.mxu1 %vm87_vm2, %v79_v14  ;;  %2391 = vmatprep.subr.mxu1 %v2740_v0  ;;  %v813_v45 = vld [vmem:[#allocation2 + $0x3a8] sm:$0xff]  ;;  %v812_v46 = vld [vmem:[#allocation2 + $0x3a0] sm:$0xff] }
  0x2e   :  { %2384 = vmatprep.mubr.msk.f32.mxu1 %vm2741_vm0, %v2740_v0  ;;  %2392 = vmatpush3.msra.mxu1 %v75_v15  ;;  %v809_v47 = vld [vmem:[#allocation2 + $0x388] sm:$0xff]  ;;  %v808_v48 = vld [vmem:[#allocation2 + $0x380] sm:$0xff] }
  0x2f   :  { %2393 = vmatprep.subr.mxu1 %v2740_v0  ;;  %2419 = vmatprep.mubr.msk.f32.mxu0 %vm2741_vm0, %v2740_v0  ;;  %v805_v49 = vld [vmem:[#allocation2 + $0x368] sm:$0xff]  ;;  %v804_v50 = vld [vmem:[#allocation2 + $0x360] sm:$0xff] }
  0x30   :  { %2394 = vmatpush3.msra.mxu1 %v74_v17  ;;  %2445 = vmatpush3.msk.msra.mxu0 %vm97_vm1, %v2203_v20  ;;  %v801_v51 = vld [vmem:[#allocation2 + $0x348] sm:$0xff]  ;;  %v800_v52 = vld [vmem:[#allocation2 + $0x340] sm:$0xff] }
  0x31   :  { %2385 = vmatmul.mubr.msk.f32.gmra.mxu1 %vm87_vm2, %v80_v18  ;;  %2395 = vmatprep.subr.mxu1 %v2740_v0  ;;  %v797_v53 = vld [vmem:[#allocation2 + $0x328] sm:$0xff]  ;;  %v796_v54 = vld [vmem:[#allocation2 + $0x320] sm:$0xff] }
  0x32   :  { %2396 = vmatpush3.msra.mxu1 %v73_v19  ;;  %2397 = vmatprep.mubr.msk.f32.mxu1 %vm2741_vm0, %v2740_v0  ;;  %v793_v55 = vld [vmem:[#allocation2 + $0x308] sm:$0xff]  ;;  %v792_v56 = vld [vmem:[#allocation2 + $0x300] sm:$0xff] }
  0x33   :  { %2425 = vmatprep.subr.mxu1 %v2740_v0  ;;  %2420 = vmatmul.mubr.msk.f32.gmra.mxu0 %vm87_vm2, %v274_v22  ;;  %v789_v57 = vld [vmem:[#allocation2 + $0x2e8] sm:$0xff]  ;;  %v788_v58 = vld [vmem:[#allocation2 + $0x2e0] sm:$0xff] }
  0x34   :  { %2446 = vmatprep.subr.mxu0 %v2740_v0  ;;  %2422 = vmatprep.mubr.msk.f32.mxu0 %vm2741_vm0, %v2740_v0  ;;  %v785_v59 = vld [vmem:[#allocation2 + $0x2c8] sm:$0xff]  ;;  %v784_v60 = vld [vmem:[#allocation2 + $0x2c0] sm:$0xff] }
  0x35   :  { %2398 = vmatmul.mubr.msk.f32.vlgmr.msra.gmra.mxu1 %vm87_vm2, %v70_v21  ;;  %2447 = vmatpush3.msra.mxu0 %v2202_v25  ;;  %v781_v61 = vld [vmem:[#allocation2 + $0x2a8] sm:$0xff]  ;;  %v780_v62 = vld [vmem:[#allocation2 + $0x2a0] sm:$0xff] }
  0x36   :  { %2400 = vmatprep.mubr.msk.f32.mxu1 %vm2741_vm0, %v2740_v0  ;;  %2426 = vmatpush3.msk.msra.mxu1 %vm97_vm1, %v2194_v23  ;;  %v777_v63 = vld [vmem:[#allocation2 + $0x288] sm:$0xff]  ;;  %v776_v1 = vld [vmem:[#allocation2 + $0x280] sm:$0xff] }
  0x37   :  { %2427 = vmatprep.subr.mxu1 %v2740_v0  ;;  %2448 = vmatprep.subr.mxu0 %v2740_v0  ;;  %v773_v2 = vld [vmem:[#allocation2 + $0x268] sm:$0xff]  ;;  %v772_v3 = vld [vmem:[#allocation2 + $0x260] sm:$0xff] }
  0x38   :  { %2428 = vmatpush3.msra.mxu1 %v2193_v24  ;;  %2449 = vmatpush3.msra.mxu0 %v2201_v28  ;;  %v769_v4 = vld [vmem:[#allocation2 + $0x248] sm:$0xff]  ;;  %v768_v5 = vld [vmem:[#allocation2 + $0x240] sm:$0xff] }
  0x39   :  { %2401 = vmatmul.mubr.msk.f32.gmra.mxu1 %vm87_vm2, %v71_v26  ;;  %2429 = vmatprep.subr.mxu1 %v2740_v0  ;;  %v765_v6 = vld [vmem:[#allocation2 + $0x228] sm:$0xff]  ;;  %v764_v7 = vld [vmem:[#allocation2 + $0x220] sm:$0xff] }
  0x3a   :  { %2403 = vmatprep.mubr.msk.f32.mxu1 %vm2741_vm0, %v2740_v0  ;;  %2430 = vmatpush3.msra.mxu1 %v2192_v27  ;;  %v761_v8 = vld [vmem:[#allocation2 + $0x208] sm:$0xff]  ;;  %v760_v9 = vld [vmem:[#allocation2 + $0x200] sm:$0xff] }
  0x3b   :  { %2431 = vmatprep.subr.mxu1 %v2740_v0  ;;  %2423 = vmatmul.mubr.msk.f32.gmra.mxu0 %vm87_vm2, %v275_v30 }
  0x3c   :  { %2450 = vmatprep.subr.mxu0 %v2740_v0  ;;  %2432 = vmatpush3.msra.mxu1 %v2191_v31 }
  0x3d   :  { %2404 = vmatmul.mubr.msk.f32.gmra.mxu1 %vm87_vm2, %v72_v29  ;;  %2451 = vmatpush3.msra.mxu0 %v2200_v32 }
  0x3e   :  { %2433 = vmatprep.subr.mxu1 %v2740_v0  ;;  %2452 = vmatprep.subr.mxu0 %v2740_v0 }
  0x3f   :  { %2434 = vmatpush3.msra.mxu1 %v2190_v33  ;;  %2435 = vmatprep.mubr.msk.f32.mxu1 %vm2741_vm0, %v2740_v0 }
  0x40   :  { %2453 = vmatpush3.msra.mxu0 %v2199_v34  ;;  %2454 = vmatprep.mubr.msk.f32.mxu0 %vm2741_vm0, %v2740_v0 }
  0x41   :  { %2436 = vmatmul.mubr.msk.f32.vlgmr.msra.gmra.mxu1 %vm87_vm2, %v377_v35  ;;  %2455 = vmatmul.mubr.msk.f32.vlgmr.msra.gmra.mxu0 %vm87_vm2, %v481_v36 }
  0x42   :  { %2438 = vmatprep.mubr.msk.f32.mxu1 %vm2741_vm0, %v2740_v0  ;;  %2457 = vmatprep.mubr.msk.f32.mxu0 %vm2741_vm0, %v2740_v0 }
  0x43   :  { %2463 = vmatprep.subr.mxu1 %v2740_v0  ;;  %824 = vmatprep.subr.mxu0 %v821_v41 }
  0x44   :  { %825 = vmatpush1.msra.mxu0 %v820_v42 }
  0x45   :  { %2439 = vmatmul.mubr.msk.f32.gmra.mxu1 %vm87_vm2, %v378_v37  ;;  %2458 = vmatmul.mubr.msk.f32.gmra.mxu0 %vm87_vm2, %v482_v38 }
  0x46   :  { %2441 = vmatprep.mubr.msk.f32.mxu1 %vm2741_vm0, %v2740_v0  ;;  %2460 = vmatprep.mubr.msk.f32.mxu0 %vm2741_vm0, %v2740_v0 }
  0x47   :  { %826 = vmatprep.subr.mxu0 %v817_v43 }
  0x48   :  { %827 = vmatpush1.msra.mxu0 %v816_v44 }
  0x49   :  { %2442 = vmatmul.mubr.msk.f32.gmra.mxu1 %vm87_vm2, %v379_v39  ;;  %2461 = vmatmul.mubr.msk.f32.gmra.mxu0 %vm87_vm2, %v483_v40 }
  0x4a   :  { %2469 = vmatprep.mubr.msk.f32.mxu1 %vm2741_vm0, %v2740_v0  ;;  %888 = vmatprep.mubr.f32.mxu0 %v2740_v0 }
  0x4b   :  { %828 = vmatprep.subr.mxu0 %v813_v45 }
  0x4c   :  { %829 = vmatpush1.msra.mxu0 %v812_v46 }
  0x4d   :  { %830 = vmatprep.subr.mxu0 %v809_v47 }
  0x4e   :  { %831 = vmatpush1.msra.mxu0 %v808_v48 }
  0x4f   :  { %832 = vmatprep.subr.mxu0 %v805_v49 }
  0x50   :  { %833 = vmatpush1.msra.mxu0 %v804_v50 }
  0x51   :  { %834 = vmatprep.subr.mxu0 %v801_v51 }
  0x52   :  { %835 = vmatpush1.msra.mxu0 %v800_v52  ;;  %v2208_v52 = vld [vmem:[%s3350_s2] ss:$0 sm:$0xff] }
  0x53   :  { %836 = vmatprep.subr.mxu0 %v797_v53 }
  0x54   :  { %837 = vmatpush1.msra.mxu0 %v796_v54 }
  0x55   :  { %838 = vmatprep.subr.mxu0 %v793_v55 }
  0x56   :  { %839 = vmatpush1.msra.mxu0 %v792_v56 }
  0x57   :  { %840 = vmatprep.subr.mxu0 %v789_v57 }
  0x58   :  { %841 = vmatpush1.msra.mxu0 %v788_v58 }
  0x59   :  { %842 = vmatprep.subr.mxu0 %v785_v59  ;;  %v3029_v59 = vld [vmem:[%s3357_s9] sm:$0xff] }
  0x5a   :  { %843 = vmatpush1.msra.mxu0 %v784_v60  ;;  %v823_v60 = vld [vmem:[#allocation2 + $0x3f8] sm:$0xff] }
  0x5b   :  { %844 = vmatprep.subr.mxu0 %v781_v61  ;;  %v822_v61 = vld [vmem:[#allocation2 + $0x3f0] sm:$0xff] }
  0x5c   :  { %845 = vmatpush1.msra.mxu0 %v780_v62  ;;  %v819_v62 = vld [vmem:[#allocation2 + $0x3d8] sm:$0xff] }
  0x5d   :  { %846 = vmatprep.subr.mxu0 %v777_v63  ;;  %v818_v63 = vld [vmem:[#allocation2 + $0x3d0] sm:$0xff] }
  0x5e   :  { %847 = vmatpush1.msra.mxu0 %v776_v1  ;;  %v3040_v1 = vld [vmem:[%s3357_s9 + $0x8] sm:$0xff] }
  0x5f   :  { %848 = vmatprep.subr.mxu0 %v773_v2  ;;  %v815_v2 = vld [vmem:[#allocation2 + $0x3b8] sm:$0xff] }
  0x60   :  { %849 = vmatpush1.msra.mxu0 %v772_v3  ;;  %v814_v3 = vld [vmem:[#allocation2 + $0x3b0] sm:$0xff] }
  0x61   :  { %850 = vmatprep.subr.mxu0 %v769_v4  ;;  %v811_v4 = vld [vmem:[#allocation2 + $0x398] sm:$0xff] }
  0x62   :  { %851 = vmatpush1.msra.mxu0 %v768_v5  ;;  %v810_v5 = vld [vmem:[#allocation2 + $0x390] sm:$0xff] }
  0x63   :  { %852 = vmatprep.subr.mxu0 %v765_v6  ;;  %v3049_v6 = vld [vmem:[%s3357_s9 + $0x10] sm:$0x3] }
  0x64   :  { %853 = vmatpush1.msra.mxu0 %v764_v7  ;;  %v807_v7 = vld [vmem:[#allocation2 + $0x378] sm:$0xff] }
  0x65   :  { %854 = vmatprep.subr.mxu0 %v761_v8  ;;  %v806_v8 = vld [vmem:[#allocation2 + $0x370] sm:$0xff] }
  0x66   :  { %855 = vmatpush1.msra.mxu0 %v760_v9  ;;  %v803_v9 = vld [vmem:[#allocation2 + $0x358] sm:$0xff] }
  0xe9   :  { %v167_v10 = vpop.f32.mrf.mxu1 }
  0xeb   :  { %v2380_v11 = vpop.f32.mrf.mxu1  ;;  %v360_v14 = vpop.f32.mrf.mxu0 }
  0xec   :  { %v799_v11 = vld [vmem:[#allocation2 + $0x338] sm:$0xff] }
  0xed   :  { %v172_v12 = vpop.f32.mrf.mxu1  ;;  %v2418_v16 = vpop.f32.mrf.mxu0 }
  0xee   :  { %v790_v16 = vld [vmem:[#allocation2 + $0x2f0] sm:$0xff] }
  0xef   :  { %v2383_v13 = vpop.f32.mrf.mxu1 }
  0xf0   :  { %v795_v13 = vld [vmem:[#allocation2 + $0x318] sm:$0xff] }
  0xf1   :  { %v177_v15 = vpop.f32.mrf.mxu1 }
  0xf3   :  { %v2386_v17 = vpop.f32.mrf.mxu1  ;;  %v365_v19 = vpop.f32.mrf.mxu0 }
  0xf4   :  { %v787_v17 = vld [vmem:[#allocation2 + $0x2d8] sm:$0xff] }
  0xf5   :  { %v259_v18 = vpop.f32.mrf.mxu1  ;;  %v2421_v21 = vpop.f32.mrf.mxu0 }
  0xf6   :  { %v260_v30 = vadd.f32 %v259_v18, %v167_v10  ;;  %v802_v10 = vld [vmem:[#allocation2 + $0x350] sm:$0xff]  ;;  %v779_v21 = vld [vmem:[#allocation2 + $0x298] sm:$0xff] }
  0xf7   :  { %v2399_v20 = vpop.f32.mrf.mxu1  ;;  %v786_v18 = vld [vmem:[#allocation2 + $0x2d0] sm:$0xff] }
  0xf8   :  { %v374_v37 = vadd.f32 %v360_v14, %v260_v30  ;;  %v794_v14 = vld [vmem:[#allocation2 + $0x310] sm:$0xff] }
  0xf9   :  { %v264_v22 = vpop.f32.mrf.mxu1  ;;  %v782_v20 = vld [vmem:[#allocation2 + $0x2b0] sm:$0xff] }
  0xfa   :  { %v265_v28 = vadd.f32 %v264_v22, %v172_v12  ;;  %v798_v12 = vld [vmem:[#allocation2 + $0x330] sm:$0xff] }
  0xfb   :  { %v2402_v23 = vpop.f32.mrf.mxu1  ;;  %v370_v25 = vpop.f32.mrf.mxu0  ;;  %v778_v22 = vld [vmem:[#allocation2 + $0x290] sm:$0xff] }
  0xfc   :  { %v375_v33 = vadd.f32 %v365_v19, %v265_v28  ;;  %v783_v19 = vld [vmem:[#allocation2 + $0x2b8] sm:$0xff]  ;;  %v766_v28 = vld [vmem:[#allocation2 + $0x230] sm:$0xff] }
  0xfd   :  { %v269_v24 = vpop.f32.mrf.mxu1  ;;  %v2424_v27 = vpop.f32.mrf.mxu0  ;;  %v775_v23 = vld [vmem:[#allocation2 + $0x278] sm:$0xff]  ;;  %v762_v30 = vld [vmem:[#allocation2 + $0x210] sm:$0xff] }
  0xfe   :  { %v270_v34 = vadd.f32 %v269_v24, %v177_v15  ;;  %v791_v15 = vld [vmem:[#allocation2 + $0x2f8] sm:$0xff]  ;;  %v774_v24 = vld [vmem:[#allocation2 + $0x270] sm:$0xff] }
  0xff   :  { %v2405_v26 = vpop.f32.mrf.mxu1  ;;  %v767_v27 = vld [vmem:[#allocation2 + $0x238] sm:$0xff] }
 0x100   :  { %v376_v41 = vadd.f32 %v370_v25, %v270_v34  ;;  %v771_v25 = vld [vmem:[#allocation2 + $0x258] sm:$0xff]  ;;  %v770_v26 = vld [vmem:[#allocation2 + $0x250] sm:$0xff] }
 0x101   :  { %v464_v29 = vpop.f32.mrf.mxu1  ;;  %v568_v31 = vpop.f32.mrf.mxu0  ;;  %v757_v34 = vld [vmem:[#allocation2 + $0x1f0] sm:$0xff] }
 0x102   :  { %v478_v42 = vadd.f32 %v464_v29, %v374_v37  ;;  %v763_v29 = vld [vmem:[#allocation2 + $0x218] sm:$0xff] }
 0x103   :  { %v2437_v32 = vpop.f32.mrf.mxu1  ;;  %v2456_v35 = vpop.f32.mrf.mxu0  ;;  %v754_v37 = vld [vmem:[#allocation2 + $0x1d8] sm:$0xff] }
 0x104   :  { %v582_v49 = vadd.f32 %v568_v31, %v478_v42  ;;  %v756_v31 = vld [vmem:[#allocation2 + $0x1e8] sm:$0xff]  ;;  %v758_v32 = vld [vmem:[#allocation2 + $0x1f8] sm:$0xff] }
 0x105   :  { %v469_v36 = vpop.f32.mrf.mxu1  ;;  %v573_v39 = vpop.f32.mrf.mxu0  ;;  %990 = vmatprep.subr.mxu0 %v756_v31  ;;  %v750_v42 = vld [vmem:[#allocation2 + $0x1b8] sm:$0xff]  ;;  %v709_v31 = vld [vmem:[#allocation2 + $0x70] sm:$0xff] }
 0x106   :  { %v479_v38 = vadd.f32 %v469_v36, %v375_v33  ;;  %v592_v55 = vadd.f32 %v2208_v52, %v582_v49  ;;  %v755_v33 = vld [vmem:[#allocation2 + $0x1e0] sm:$0xff]  ;;  %v752_v36 = vld [vmem:[#allocation2 + $0x1c8] sm:$0xff]  ;;  %v745_v49 = vld [vmem:[#allocation2 + $0x190] sm:$0xff] }
 0x107   :  { %v2440_v40 = vpop.f32.mrf.mxu1  ;;  %v2459_v43 = vpop.f32.mrf.mxu0 }
 0x108   :  { %v583_v45 = vadd.f32 %v573_v39, %v479_v38  ;;  %v3023_v58 = vmax.f32 %v592_v55, 0.0  ;;  %v751_v38 = vld [vmem:[#allocation2 + $0x1c0] sm:$0xff]  ;;  %v753_v39 = vld [vmem:[#allocation2 + $0x1d0] sm:$0xff]  ;;  %v736_v55 = vld [vmem:[#allocation2 + $0x148] sm:$0xff] }
 0x109   :  { %v474_v44 = vpop.f32.mrf.mxu1  ;;  %v578_v47 = vpop.f32.mrf.mxu0  ;;  %v747_v43 = vld [vmem:[#allocation2 + $0x1a0] sm:$0xff] }
 0x10a   :  { %v480_v46 = vadd.f32 %v474_v44, %v376_v41  ;;  %v593_v53 = vadd.f32 %v2208_v52, %v583_v45  ;;  %v748_v41 = vld [vmem:[#allocation2 + $0x1a8] sm:$0xff]  ;;  %v749_v44 = vld [vmem:[#allocation2 + $0x1b0] sm:$0xff] }
 0x10b   :  { %v2443_v48 = vpop.f32.mrf.mxu1  ;;  %v2462_v51 = vpop.f32.mrf.mxu0  ;;  %v744_v45 = vld [vmem:[#allocation2 + $0x188] sm:$0xff] }
 0x10c   :  { %v584_v50 = vadd.f32 %v578_v47, %v480_v46  ;;  %v3018_v57 = vmax.f32 %v593_v53, 0.0  ;;  %v746_v46 = vld [vmem:[#allocation2 + $0x198] sm:$0xff]  ;;  %v743_v48 = vld [vmem:[#allocation2 + $0x180] sm:$0xff] }
 0x10d   :  { %v742_v51 = vld [vmem:[#allocation2 + $0x178] sm:$0xff]  ;;  %v739_v53 = vld [vmem:[#allocation2 + $0x160] sm:$0xff] }
 0x10e   :  { %v594_v54 = vadd.f32 %v2208_v52, %v584_v50  ;;  %v740_v50 = vld [vmem:[#allocation2 + $0x168] sm:$0xff] }
 0x110   :  { %v3016_v56 = vmax.f32 %v594_v54, 0.0  ;;  %v741_v54 = vld [vmem:[#allocation2 + $0x170] sm:$0xff] }
 0x112   :  { %2464 = vmatpush3.msk.msra.mxu1 %vm611_vm3, %v3016_v56 }
 0x113   :  { %2465 = vmatprep.subr.mxu1 %v2740_v0 }
 0x114   :  { %2466 = vmatpush3.msra.mxu1 %v3018_v57 }
 0x115   :  { %2467 = vmatprep.subr.mxu1 %v2740_v0 }
 0x116   :  { %2468 = vmatpush3.msra.mxu1 %v3023_v58 }
 0x117   :  { %2470 = vmatmul.mubr.msk.f32.vlgmr.msra.gmra.mxu1 %vm601_vm4, %v3029_v59  ;;  %907 = vmatprep.subr.mxu1 %v823_v60  ;;  %v738_v60 = vld [vmem:[#allocation2 + $0x158] sm:$0xff] }
 0x118   :  { %2472 = vmatprep.mubr.msk.f32.mxu1 %vm2741_vm0, %v2740_v0  ;;  %908 = vmatpush1.msra.mxu1 %v822_v61 }
 0x119   :  { %909 = vmatprep.subr.mxu1 %v819_v62  ;;  %v735_v62 = vld [vmem:[#allocation2 + $0x140] sm:$0xff] }
 0x11a   :  { %910 = vmatpush1.msra.mxu1 %v818_v63  ;;  %v737_v63 = vld [vmem:[#allocation2 + $0x150] sm:$0xff] }
 0x11b   :  { %2473 = vmatmul.mubr.msk.f32.gmra.mxu1 %vm601_vm4, %v3040_v1  ;;  %911 = vmatprep.subr.mxu1 %v815_v2  ;;  %v732_v2 = vld [vmem:[#allocation2 + $0x128] sm:$0xff] }
 0x11c   :  { %2475 = vmatprep.mubr.msk.f32.mxu1 %vm2741_vm0, %v2740_v0  ;;  %912 = vmatpush1.msra.mxu1 %v814_v3  ;;  %v734_v3 = vld [vmem:[#allocation2 + $0x138] sm:$0xff] }
 0x11d   :  { %913 = vmatprep.subr.mxu1 %v811_v4 }
 0x11e   :  { %914 = vmatpush1.msra.mxu1 %v810_v5  ;;  %v731_v5 = vld [vmem:[#allocation2 + $0x120] sm:$0xff] }
 0x11f   :  { %2476 = vmatmul.mubr.msk.f32.gmra.mxu1 %vm601_vm4, %v3049_v6  ;;  %915 = vmatprep.subr.mxu1 %v807_v7  ;;  %v733_v7 = vld [vmem:[#allocation2 + $0x130] sm:$0xff] }
 0x120   :  { %916 = vmatpush1.msra.mxu1 %v806_v8  ;;  %971 = vmatprep.mubr.f32.mxu1 %v2740_v0  ;;  %v728_v8 = vld [vmem:[#allocation2 + $0x108] sm:$0xff] }
 0x121   :  { %917 = vmatprep.subr.mxu1 %v803_v9  ;;  %v730_v9 = vld [vmem:[#allocation2 + $0x118] sm:$0xff] }
 0x122   :  { %918 = vmatpush1.msra.mxu1 %v802_v10  ;;  %v727_v10 = vld [vmem:[#allocation2 + $0x100] sm:$0xff] }
 0x123   :  { %919 = vmatprep.subr.mxu1 %v799_v11  ;;  %v729_v11 = vld [vmem:[#allocation2 + $0x110] sm:$0xff] }
 0x124   :  { %920 = vmatpush1.msra.mxu1 %v798_v12  ;;  %v724_v12 = vld [vmem:[#allocation2 + $0xe8] sm:$0xff] }
 0x125   :  { %921 = vmatprep.subr.mxu1 %v795_v13  ;;  %v726_v13 = vld [vmem:[#allocation2 + $0xf8] sm:$0xff] }
 0x126   :  { %922 = vmatpush1.msra.mxu1 %v794_v14  ;;  %v723_v14 = vld [vmem:[#allocation2 + $0xe0] sm:$0xff] }
 0x127   :  { %923 = vmatprep.subr.mxu1 %v791_v15  ;;  %v725_v15 = vld [vmem:[#allocation2 + $0xf0] sm:$0xff] }
 0x128   :  { %924 = vmatpush1.msra.mxu1 %v790_v16  ;;  %v720_v16 = vld [vmem:[#allocation2 + $0xc8] sm:$0xff] }
 0x129   :  { %925 = vmatprep.subr.mxu1 %v787_v17  ;;  %v722_v17 = vld [vmem:[#allocation2 + $0xd8] sm:$0xff] }
 0x12a   :  { %926 = vmatpush1.msra.mxu1 %v786_v18  ;;  %v719_v18 = vld [vmem:[#allocation2 + $0xc0] sm:$0xff] }
 0x12b   :  { %927 = vmatprep.subr.mxu1 %v783_v19  ;;  %v721_v19 = vld [vmem:[#allocation2 + $0xd0] sm:$0xff] }
 0x12c   :  { %928 = vmatpush1.msra.mxu1 %v782_v20  ;;  %v716_v20 = vld [vmem:[#allocation2 + $0xa8] sm:$0xff] }
 0x12d   :  { %929 = vmatprep.subr.mxu1 %v779_v21  ;;  %v718_v21 = vld [vmem:[#allocation2 + $0xb8] sm:$0xff] }
 0x12e   :  { %930 = vmatpush1.msra.mxu1 %v778_v22  ;;  %v715_v22 = vld [vmem:[#allocation2 + $0xa0] sm:$0xff] }
 0x12f   :  { %931 = vmatprep.subr.mxu1 %v775_v23  ;;  %v717_v23 = vld [vmem:[#allocation2 + $0xb0] sm:$0xff] }
 0x130   :  { %932 = vmatpush1.msra.mxu1 %v774_v24  ;;  %v712_v24 = vld [vmem:[#allocation2 + $0x88] sm:$0xff] }
 0x131   :  { %933 = vmatprep.subr.mxu1 %v771_v25  ;;  %v714_v25 = vld [vmem:[#allocation2 + $0x98] sm:$0xff] }
 0x132   :  { %934 = vmatpush1.msra.mxu1 %v770_v26  ;;  %v711_v26 = vld [vmem:[#allocation2 + $0x80] sm:$0xff] }
 0x133   :  { %935 = vmatprep.subr.mxu1 %v767_v27  ;;  %v713_v27 = vld [vmem:[#allocation2 + $0x90] sm:$0xff] }
 0x134   :  { %936 = vmatpush1.msra.mxu1 %v766_v28  ;;  %v708_v28 = vld [vmem:[#allocation2 + $0x68] sm:$0xff] }
 0x135   :  { %937 = vmatprep.subr.mxu1 %v763_v29  ;;  %v710_v29 = vld [vmem:[#allocation2 + $0x78] sm:$0xff] }
 0x136   :  { %938 = vmatpush1.msra.mxu1 %v762_v30  ;;  %v707_v30 = vld [vmem:[#allocation2 + $0x60] sm:$0xff] }
 0x137   :  { %1073 = vmatprep.subr.mxu1 %v758_v32  ;;  %v704_v32 = vld [vmem:[#allocation2 + $0x48] sm:$0xff] }
 0x1d7   :  { %v681_v35 = vpop.f32.mrf.mxu1 }
 0x1d8   :  { %889 = vmatmul.mubr.f32.vlgmr.msra.gmra.mxu0 %v681_v35  ;;  %972 = vmatmul.mubr.f32.vlgmr.msra.gmra.mxu1 %v681_v35  ;;  %v705_v35 = vld [vmem:[#allocation2 + $0x50] sm:$0xff] }
 0x1d9   :  { %991 = vmatpush1.msra.mxu0 %v755_v33  ;;  %1074 = vmatpush1.msra.mxu1 %v757_v34  ;;  %v2471_v40 = vpop.f32.mrf.mxu1  ;;  %v706_v33 = vld [vmem:[#allocation2 + $0x58] sm:$0xff]  ;;  %v703_v34 = vld [vmem:[#allocation2 + $0x40] sm:$0xff] }
 0x1da   :  { %992 = vmatprep.subr.mxu0 %v752_v36  ;;  %1075 = vmatprep.subr.mxu1 %v754_v37  ;;  %v700_v36 = vld [vmem:[#allocation2 + $0x28] sm:$0xff]  ;;  %v702_v37 = vld [vmem:[#allocation2 + $0x38] sm:$0xff] }
 0x1db   :  { %993 = vmatpush1.msra.mxu0 %v751_v38  ;;  %1076 = vmatpush1.msra.mxu1 %v753_v39  ;;  %v3054_v47 = vpop.f32.mrf.mxu1  ;;  %v699_v38 = vld [vmem:[#allocation2 + $0x20] sm:$0xff]  ;;  %v701_v39 = vld [vmem:[#allocation2 + $0x30] sm:$0xff]  ;;  %v696_v40 = vld [vmem:[#allocation2 + $0x8] sm:$0xff] }
 0x1dc   :  { %994 = vmatprep.subr.mxu0 %v748_v41  ;;  %1077 = vmatprep.subr.mxu1 %v750_v42  ;;  %v698_v41 = vld [vmem:[#allocation2 + $0x18] sm:$0xff]  ;;  %v695_v42 = vld [vmem:[#allocation2] sm:$0xff] }
 0x1dd   :  { %995 = vmatpush1.msra.mxu0 %v747_v43  ;;  %1078 = vmatpush1.msra.mxu1 %v749_v44  ;;  %v2474_v52 = vpop.f32.mrf.mxu1  ;;  %v697_v43 = vld [vmem:[#allocation2 + $0x10] sm:$0xff] }
 0x1de   :  { %996 = vmatprep.subr.mxu0 %v744_v45  ;;  %1079 = vmatprep.subr.mxu1 %v746_v46 }
 0x1df   :  { %997 = vmatpush1.msra.mxu0 %v743_v48  ;;  %1080 = vmatpush1.msra.mxu1 %v745_v49  ;;  %v3056_v61 = vpop.f32.mrf.mxu1 }
 0x1e0   :  { %998 = vmatprep.subr.mxu0 %v740_v50  ;;  %1081 = vmatprep.subr.mxu1 %v742_v51 }
 0x1e1   :  { %999 = vmatpush1.msra.mxu0 %v739_v53  ;;  %1082 = vmatpush1.msra.mxu1 %v741_v54  ;;  %v2477_v4 = vpop.f32.mrf.mxu1  ;;  %v1158_v54 = vlaneseq }
 0x1e2   :  { %1000 = vmatprep.subr.mxu0 %v736_v55  ;;  %1083 = vmatprep.subr.mxu1 %v738_v60 }
 0x1e3   :  { %1001 = vmatpush1.msra.mxu0 %v735_v62  ;;  %1084 = vmatpush1.msra.mxu1 %v737_v63  ;;  %v1159_v62 = vshrl.u32 %v1158_v54, 7 }
 0x1e4   :  { %1002 = vmatprep.subr.mxu0 %v732_v2  ;;  %1085 = vmatprep.subr.mxu1 %v734_v3 }
 0x1e5   :  { %1003 = vmatpush1.msra.mxu0 %v731_v5  ;;  %1086 = vmatpush1.msra.mxu1 %v733_v7  ;;  %v1160_v5 = vsub.s32 0, %v1159_v62  ;;  %v1156_v7 = vld [vmem:[%s3352_s4] sm:$0xf] }
 0x1e6   :  { %1004 = vmatprep.subr.mxu0 %v728_v8  ;;  %1087 = vmatprep.subr.mxu1 %v730_v9  ;;  %v1164_v8 = vsub.s32 1, %v1159_v62 }
 0x1e7   :  { %1005 = vmatpush1.msra.mxu0 %v727_v10  ;;  %1088 = vmatpush1.msra.mxu1 %v729_v11 }
 0x1e8   :  { %1006 = vmatprep.subr.mxu0 %v724_v12  ;;  %1089 = vmatprep.subr.mxu1 %v726_v13 }
 0x1e9   :  { %1007 = vmatpush1.msra.mxu0 %v723_v14  ;;  %1090 = vmatpush1.msra.mxu1 %v725_v15  ;;  %v1161_v14 = vrot.slane %v1156_v7, %v1160_v5  ;;  %v1392_v5 = vld [vmem:[%s3358_s10] sm:$0x3] }
 0x1ea   :  { %1008 = vmatprep.subr.mxu0 %v720_v16  ;;  %1091 = vmatprep.subr.mxu1 %v722_v17  ;;  %v1165_v17 = vrot.slane %v1156_v7, %v1164_v8  ;;  %v1584_v8 = vld [vmem:[#allocation5 + $0xf8] sm:$0xff] }
 0x1eb   :  { %1009 = vmatpush1.msra.mxu0 %v719_v18  ;;  %1092 = vmatpush1.msra.mxu1 %v721_v19 }
 0x1ec   :  { %1010 = vmatprep.subr.mxu0 %v716_v20  ;;  %1093 = vmatprep.subr.mxu1 %v718_v21  ;;  %v1172_v21 = vsub.s32 3, %v1159_v62 }
 0x1ed   :  { %894 = vmatprep.mubr.f32.mxu0 %v2740_v0  ;;  %977 = vmatprep.mubr.f32.mxu1 %v2740_v0 }
 0x1ee   :  { %1011 = vmatpush1.msra.mxu0 %v715_v22  ;;  %1094 = vmatpush1.msra.mxu1 %v717_v23  ;;  %v1168_v23 = vsub.s32 2, %v1159_v62 }
 0x1ef   :  { %895 = vmatmul.mubr.f32.gmra.mxu0 %v3054_v47  ;;  %978 = vmatmul.mubr.f32.gmra.mxu1 %v3054_v47 }
 0x1f0   :  { %1012 = vmatprep.subr.mxu0 %v712_v24  ;;  %1095 = vmatprep.subr.mxu1 %v714_v25 }
 0x1f1   :  { %1013 = vmatpush1.msra.mxu0 %v711_v26  ;;  %1096 = vmatpush1.msra.mxu1 %v713_v27 }
 0x1f2   :  { %1014 = vmatprep.subr.mxu0 %v708_v28  ;;  %1097 = vmatprep.subr.mxu1 %v710_v29 }
 0x1f3   :  { %900 = vmatprep.mubr.f32.mxu0 %v2740_v0  ;;  %983 = vmatprep.mubr.f32.mxu1 %v2740_v0 }
 0x1f4   :  { %1015 = vmatpush1.msra.mxu0 %v707_v30  ;;  %1098 = vmatpush1.msra.mxu1 %v709_v31 }
 0x1f5   :  { %901 = vmatmul.mubr.f32.gmra.mxu0 %v3056_v61  ;;  %984 = vmatmul.mubr.f32.gmra.mxu1 %v3056_v61 }
 0x1f6   :  { %1016 = vmatprep.subr.mxu0 %v704_v32  ;;  %1099 = vmatprep.subr.mxu1 %v706_v33  ;;  %v1173_v32 = vrot.slane %v1156_v7, %v1172_v21 }
 0x1f7   :  { %1017 = vmatpush1.msra.mxu0 %v703_v34  ;;  %1100 = vmatpush1.msra.mxu1 %v705_v35  ;;  %v1169_v35 = vrot.slane %v1156_v7, %v1168_v23  ;;  %v1578_v23 = vld [vmem:[#allocation5 + $0xc8] sm:$0xff] }
 0x1f8   :  { %1018 = vmatprep.subr.mxu0 %v700_v36  ;;  %1101 = vmatprep.subr.mxu1 %v702_v37 }
 0x1f9   :  { %1019 = vmatpush1.msra.mxu0 %v699_v38  ;;  %1102 = vmatpush1.msra.mxu1 %v701_v39 }
 0x1fa   :  { %1020 = vmatprep.subr.mxu0 %v696_v40  ;;  %1103 = vmatprep.subr.mxu1 %v698_v41 }
 0x1fb   :  { %1021 = vmatpush1.msra.mxu0 %v695_v42  ;;  %1054 = vmatprep.mubr.f32.mxu0 %v2740_v0 }
 0x1fc   :  { %1104 = vmatpush1.msra.mxu1 %v697_v43  ;;  %1137 = vmatprep.mubr.f32.mxu1 %v2740_v0 }
 0x1fd   :  { %1055 = vmatmul.mubr.f32.vlgmr.msra.gmra.mxu0 %v3023_v58  ;;  %1138 = vmatmul.mubr.f32.vlgmr.msra.gmra.mxu1 %v3023_v58 }
 0x1fe   :  { %1060 = vmatprep.mubr.f32.mxu0 %v2740_v0  ;;  %1143 = vmatprep.mubr.f32.mxu1 %v2740_v0 }
 0x201   :  { %1061 = vmatmul.mubr.f32.gmra.mxu0 %v3018_v57  ;;  %1144 = vmatmul.mubr.f32.gmra.mxu1 %v3018_v57 }
 0x202   :  { %1066 = vmatprep.mubr.f32.mxu0 %v2740_v0  ;;  %1149 = vmatprep.mubr.f32.mxu1 %v2740_v0 }
 0x205   :  { %1067 = vmatmul.mubr.f32.gmra.mxu0 %v3016_v56  ;;  %1150 = vmatmul.mubr.f32.gmra.mxu1 %v3016_v56 }
 0x206   :  { %1278 = vmatprep.mubr.f32.mxu0 %v2740_v0  ;;  %1290 = vmatprep.mubr.f32.mxu1 %v2740_v0 }
 0x298   :  { %v890_v58 = vpop.f32.mrf.mxu0  ;;  %v973_v44 = vpop.f32.mrf.mxu1 }
 0x29a   :  { %v892_v45 = vpop.f32.mrf.mxu0  ;;  %v975_v46 = vpop.f32.mrf.mxu1 }
 0x2af   :  { %v896_v47 = vpop.f32.mrf.mxu0  ;;  %v979_v48 = vpop.f32.mrf.mxu1 }
 0x2b1   :  { %v898_v49 = vpop.f32.mrf.mxu0  ;;  %v981_v57 = vpop.f32.mrf.mxu1 }
 0x2b5   :  { %v902_v50 = vpop.f32.mrf.mxu0  ;;  %v985_v51 = vpop.f32.mrf.mxu1 }
 0x2b7   :  { %v904_v52 = vpop.f32.mrf.mxu0  ;;  %v987_v53 = vpop.f32.mrf.mxu1 }
 0x2bd   :  { %v1056_v55 = vpop.f32.mrf.mxu0  ;;  %v1139_v60 = vpop.f32.mrf.mxu1 }
 0x2be   :  { %v1057_v20 = vadd.f32 %v1056_v55, %v890_v58  ;;  %v1140_v41 = vadd.f32 %v1139_v60, %v973_v44 }
 0x2bf   :  { %v1058_v56 = vpop.f32.mrf.mxu0  ;;  %v1141_v61 = vpop.f32.mrf.mxu1 }
 0x2c0   :  { %v1059_v16 = vadd.f32 %v1058_v56, %v892_v45  ;;  %v1178_v31 = vadd.f32 %v1161_v14, %v1057_v20  ;;  %v1142_v38 = vadd.f32 %v1141_v61, %v975_v46  ;;  %v3098_v44 = vadd.f32 %v1169_v35, %v1140_v41  ;;  %v1579_v20 = vld [vmem:[#allocation5 + $0xd0] sm:$0xff]  ;;  %v1569_v41 = vld [vmem:[#allocation5 + $0x80] sm:$0xff] }
 0x2c1   :  { %v1062_v63 = vpop.f32.mrf.mxu0  ;;  %v1145_v2 = vpop.f32.mrf.mxu1 }
 0x2c2   :  { %v1063_v15 = vadd.f32 %v1062_v63, %v896_v47  ;;  %v1179_v28 = vadd.f32 %v1165_v17, %v1059_v16  ;;  %v1146_v36 = vadd.f32 %v1145_v2, %v979_v48  ;;  %v1190_v58 = vmax.f32 %v1178_v31, 0.0  ;;  %v1574_v31 = vld [vmem:[#allocation5 + $0xa8] sm:$0xff] }
 0x2c3   :  { %v1064_v3 = vpop.f32.mrf.mxu0  ;;  %v1147_v4 = vpop.f32.mrf.mxu1  ;;  %v3095_v46 = vadd.f32 %v1173_v32, %v1142_v38  ;;  %v1559_v38 = vld [vmem:[#allocation5 + $0x40] sm:$0xff] }
 0x2c4   :  { %v1065_v12 = vadd.f32 %v1064_v3, %v898_v49  ;;  %v1182_v26 = vadd.f32 %v1161_v14, %v1063_v15  ;;  %v1148_v33 = vadd.f32 %v1147_v4, %v981_v57  ;;  %v1191_v42 = vmax.f32 %v1179_v28, 0.0  ;;  %v1564_v28 = vld [vmem:[#allocation5 + $0x68] sm:$0xff] }
 0x2c5   :  { %v1068_v9 = vpop.f32.mrf.mxu0  ;;  %v1151_v10 = vpop.f32.mrf.mxu1  ;;  %v3093_v47 = vadd.f32 %v1169_v35, %v1146_v36  ;;  %v1560_v36 = vld [vmem:[#allocation5 + $0x48] sm:$0xff] }
 0x2c6   :  { %v1069_v11 = vadd.f32 %v1068_v9, %v902_v50  ;;  %v1183_v24 = vadd.f32 %v1165_v17, %v1065_v12  ;;  %v1152_v29 = vadd.f32 %v1151_v10, %v985_v51  ;;  %v1194_v39 = vmax.f32 %v1182_v26, 0.0  ;;  %v1583_v10 = vld [vmem:[#allocation5 + $0xf0] sm:$0xff]  ;;  %v1582_v12 = vld [vmem:[#allocation5 + $0xe8] sm:$0xff] }
 0x2c7   :  { %v1070_v13 = vpop.f32.mrf.mxu0  ;;  %v1153_v19 = vpop.f32.mrf.mxu1  ;;  %v3091_v45 = vadd.f32 %v1173_v32, %v1148_v33  ;;  %v1196_v50 = vmax.f32 %v3093_v47, 0.0  ;;  %v1193_v51 = vmax.f32 %v3095_v46, 0.0  ;;  %v1565_v26 = vld [vmem:[#allocation5 + $0x70] sm:$0xff]  ;;  %v1573_v33 = vld [vmem:[#allocation5 + $0xa0] sm:$0xff]  ;;  %v1552_v46 = vld [vmem:[#allocation5 + $0x8] sm:$0xff] }
 0x2c8   :  { %v1071_v18 = vadd.f32 %v1070_v13, %v904_v52  ;;  %v1186_v22 = vadd.f32 %v1161_v14, %v1069_v11  ;;  %v1154_v27 = vadd.f32 %v1153_v19, %v987_v53  ;;  %v1195_v37 = vmax.f32 %v1183_v24, 0.0  ;;  %v1581_v14 = vld [vmem:[#allocation5 + $0xe0] sm:$0xff]  ;;  %v1566_v24 = vld [vmem:[#allocation5 + $0x78] sm:$0xff]  ;;  %v1553_v47 = vld [vmem:[#allocation5 + $0x10] sm:$0xff] }
 0x2c9   :  { %v3089_v43 = vadd.f32 %v1169_v35, %v1152_v29  ;;  %v1197_v57 = vmax.f32 %v3091_v45, 0.0  ;;  %v1192_v52 = vmax.f32 %v3098_v44, 0.0  ;;  %v1575_v29 = vld [vmem:[#allocation5 + $0xb0] sm:$0xff]  ;;  %v1572_v35 = vld [vmem:[#allocation5 + $0x98] sm:$0xff] }
 0x2ca   :  { %v1187_v25 = vadd.f32 %v1165_v17, %v1071_v18  ;;  %v1198_v34 = vmax.f32 %v1186_v22, 0.0  ;;  %v3085_v40 = vadd.f32 %v1173_v32, %v1154_v27  ;;  %v1580_v17 = vld [vmem:[#allocation5 + $0xd8] sm:$0xff] }
 0x2cb   :  { %v1200_v49 = vmax.f32 %v3089_v43, 0.0  ;;  %v1576_v27 = vld [vmem:[#allocation5 + $0xb8] sm:$0xff]  ;;  %v1556_v43 = vld [vmem:[#allocation5 + $0x28] sm:$0xff] }
 0x2cc   :  { %v1199_v30 = vmax.f32 %v1187_v25, 0.0  ;;  %v1201_v48 = vmax.f32 %v3085_v40, 0.0  ;;  %v1577_v25 = vld [vmem:[#allocation5 + $0xc0] sm:$0xff]  ;;  %v1562_v32 = vld [vmem:[#allocation5 + $0x58] sm:$0xff] }
 0x2cd   :  { %v1558_v40 = vld [vmem:[#allocation5 + $0x38] sm:$0xff] }
 0x2ce   :  { %2213 = vmatprep.subr.msk.mxu0 %vm611_vm3, %v1199_v30  ;;  %2653 = vmatprep.subr.msk.mxu1 %vm611_vm3, %v1199_v30  ;;  %v1554_v45 = vld [vmem:[#allocation5 + $0x18] sm:$0xff] }
 0x2cf   :  { %2214 = vmatpush1.msk.msra.mxu0 %vm611_vm3, %v1198_v34  ;;  %2656 = vmatpush1.msk.msra.mxu1 %vm611_vm3, %v1198_v34 }
 0x2d0   :  { %1242 = vmatprep.subr.mxu0 %v1195_v37  ;;  %2654 = vmatprep.subr.mxu1 %v1195_v37 }
 0x2d1   :  { %1243 = vmatpush1.msra.mxu0 %v1194_v39  ;;  %2657 = vmatpush1.msra.mxu1 %v1194_v39 }
 0x2d2   :  { %1244 = vmatprep.subr.mxu0 %v1191_v42  ;;  %2655 = vmatprep.subr.mxu1 %v1191_v42 }
 0x2d3   :  { %1245 = vmatpush1.msra.mxu0 %v1190_v58  ;;  %2658 = vmatpush1.msra.mxu1 %v1190_v58 }
 0x2d4   :  { %2215 = vmatmul.mubr.msk.f32.vlgmr.msra.gmra.mxu0 %vm601_vm4, %v3029_v59  ;;  %2217 = vmatmul.mubr.msk.f32.vlgmr.msra.gmra.mxu1 %vm601_vm4, %v3049_v6 }
 0x2d5   :  { %2218 = vmatprep.subr.msk.mxu1 %vm611_vm3, %v1201_v48  ;;  %1284 = vmatprep.mubr.f32.mxu0 %v2740_v0 }
 0x2d6   :  { %2219 = vmatpush1.msk.msra.mxu1 %vm611_vm3, %v1200_v49  ;;  %1361 = vmatprep.mubr.f32.mxu1 %v2740_v0 }
 0x2d7   :  { %1325 = vmatprep.subr.mxu1 %v1197_v57 }
 0x2d8   :  { %1326 = vmatpush1.msra.mxu1 %v1196_v50  ;;  %2216 = vmatmul.mubr.msk.f32.gmra.mxu0 %vm601_vm4, %v3040_v1 }
 0x2d9   :  { %1327 = vmatprep.subr.mxu1 %v1193_v51  ;;  %1472 = vmatprep.mubr.f32.mxu0 %v2740_v0 }
 0x2da   :  { %1328 = vmatpush1.msra.mxu1 %v1192_v52 }
 0x2db   :  { %2220 = vmatmul.mubr.msk.f32.vlgmr.msra.gmra.mxu1 %vm601_vm4, %v3029_v59 }
 0x2dc   :  { %1367 = vmatprep.mubr.f32.mxu1 %v2740_v0 }
 0x2df   :  { %2221 = vmatmul.mubr.msk.f32.gmra.mxu1 %vm601_vm4, %v3040_v1 }
 0x2e0   :  { %1373 = vmatprep.mubr.f32.mxu1 %v2740_v0 }
 0x2e3   :  { %2222 = vmatmul.mubr.msk.f32.gmra.mxu1 %vm601_vm4, %v3049_v6 }
 0x2e4   :  { %1543 = vmatprep.mubr.f32.mxu1 %v2740_v0 }
 0x394   :  { %v1280_v53 = vpop.f32.mrf.mxu0  ;;  %v1292_v54 = vpop.f32.mrf.mxu1 }
 0x395   :  { %v3131_v61 = vmax.f32 %v1198_v34, %v1292_v54  ;;  %v3144_v4 = vmax.f32 %v1190_v58, %v1280_v53  ;;  %v1561_v34 = vld [vmem:[#allocation5 + $0x50] sm:$0xff]  ;;  %v1555_v58 = vld [vmem:[#allocation5 + $0x20] sm:$0xff]  ;;  %v1975_v54 = vld [vmem:[#allocation5 + $0x1e8] sm:$0xff] }
 0x396   :  { %v1282_v55 = vpop.f32.mrf.mxu0  ;;  %v1294_v60 = vpop.f32.mrf.mxu1 }
 0x397   :  { %v3129_v56 = vmax.f32 %v1199_v30, %v1294_v60  ;;  %v3141_v2 = vmax.f32 %v1191_v42, %v1282_v55  ;;  %v1563_v30 = vld [vmem:[#allocation5 + $0x60] sm:$0xff]  ;;  %v1557_v42 = vld [vmem:[#allocation5 + $0x30] sm:$0xff] }
 0x398   :  { %v1286_v59 = vpop.f32.mrf.mxu0  ;;  %v1974_v60 = vld [vmem:[#allocation5 + $0x1e0] sm:$0xff] }
 0x399   :  { %2223 = vmatprep.subr.msk.mxu0 %vm611_vm3, %v3129_v56  ;;  %v3139_v63 = vmax.f32 %v1194_v39, %v1286_v59  ;;  %v1570_v39 = vld [vmem:[#allocation5 + $0x88] sm:$0xff]  ;;  %v1973_v59 = vld [vmem:[#allocation5 + $0x1d8] sm:$0xff] }
 0x39a   :  { %v1288_v1 = vpop.f32.mrf.mxu0  ;;  %2224 = vmatpush1.msk.msra.mxu0 %vm611_vm3, %v3131_v61 }
 0x39b   :  { %v3137_v62 = vmax.f32 %v1195_v37, %v1288_v1  ;;  %v1363_v6 = vpop.f32.mrf.mxu1  ;;  %v1571_v37 = vld [vmem:[#allocation5 + $0x90] sm:$0xff] }
 0x39c   :  { %v3179_v22 = vmax.f32 %v1192_v52, %v1363_v6  ;;  %v1976_v52 = vld [vmem:[#allocation5 + $0x1f0] sm:$0xff]  ;;  %v1888_v6 = vld [vmem:[#allocation5 + $0x178] sm:$0xff] }
 0x39d   :  { %v1365_v3 = vpop.f32.mrf.mxu1  ;;  %1436 = vmatprep.subr.mxu0 %v3137_v62  ;;  %v1972_v1 = vld [vmem:[#allocation5 + $0x1d0] sm:$0xff] }
 0x39e   :  { %1437 = vmatpush1.msra.mxu0 %v3139_v63  ;;  %v3174_v21 = vmax.f32 %v1193_v51, %v1365_v3  ;;  %v1977_v51 = vld [vmem:[#allocation5 + $0x1f8] sm:$0xff]  ;;  %v1971_v3 = vld [vmem:[#allocation5 + $0x1c8] sm:$0xff] }
 0x39f   :  { %v1369_v7 = vpop.f32.mrf.mxu1  ;;  %1438 = vmatprep.subr.mxu0 %v3141_v2 }
 0x3a0   :  { %1439 = vmatpush1.msra.mxu0 %v3144_v4  ;;  %v3169_v19 = vmax.f32 %v1196_v50, %v1369_v7  ;;  %v1725_v50 = vld [vmem:[%s3359_s11] sm:$0x3]  ;;  %v1884_v7 = vld [vmem:[#allocation5 + $0x158] sm:$0xff] }
 0x3a1   :  { %v1371_v9 = vpop.f32.mrf.mxu1  ;;  %2225 = vmatmul.mubr.msk.f32.vlgmr.msra.gmra.mxu0 %vm601_vm4, %v1392_v5  ;;  %2478 = vmatprep.subr.mxu0 %v2740_v0 }
 0x3a2   :  { %2479 = vmatpush3.msra.mxu0 %v1584_v8  ;;  %2510 = vmatprep.mubr.msk.f32.mxu0 %vm2741_vm0, %v2740_v0  ;;  %v3165_v18 = vmax.f32 %v1197_v57, %v1371_v9  ;;  %v1883_v8 = vld [vmem:[#allocation5 + $0x150] sm:$0xff]  ;;  %v1882_v9 = vld [vmem:[#allocation5 + $0x148] sm:$0xff] }
 0x3a3   :  { %v1375_v11 = vpop.f32.mrf.mxu1  ;;  %2480 = vmatprep.subr.mxu0 %v2740_v0 }
 0x3a4   :  { %2481 = vmatpush3.msra.mxu0 %v1583_v10  ;;  %v3162_v16 = vmax.f32 %v1200_v49, %v1375_v11  ;;  %v1881_v10 = vld [vmem:[#allocation5 + $0x140] sm:$0xff]  ;;  %v1880_v11 = vld [vmem:[#allocation5 + $0x138] sm:$0xff] }
 0x3a5   :  { %v1377_v13 = vpop.f32.mrf.mxu1  ;;  %2482 = vmatprep.subr.mxu0 %v2740_v0 }
 0x3a6   :  { %v3160_v15 = vmax.f32 %v1201_v48, %v1377_v13  ;;  %2483 = vmatpush3.msra.mxu0 %v1582_v12  ;;  %v1551_v48 = vld [vmem:[#allocation5] sm:$0xff]  ;;  %v1879_v12 = vld [vmem:[#allocation5 + $0x130] sm:$0xff]  ;;  %v1878_v13 = vld [vmem:[#allocation5 + $0x128] sm:$0xff] }
 0x3a7   :  { %2484 = vmatprep.subr.mxu0 %v2740_v0 }
 0x3a8   :  { %2226 = vmatprep.subr.msk.mxu1 %vm611_vm3, %v3160_v15  ;;  %2485 = vmatpush3.msra.mxu0 %v1581_v14  ;;  %v1967_v14 = vld [vmem:[#allocation5 + $0x1a8] sm:$0xff] }
 0x3a9   :  { %2227 = vmatpush1.msk.msra.mxu1 %vm611_vm3, %v3162_v16  ;;  %2486 = vmatprep.subr.mxu0 %v2740_v0 }
 0x3aa   :  { %1507 = vmatprep.subr.mxu1 %v3165_v18  ;;  %2487 = vmatpush3.msra.mxu0 %v1580_v17  ;;  %v1965_v17 = vld [vmem:[#allocation5 + $0x198] sm:$0xff] }
 0x3ab   :  { %1508 = vmatpush1.msra.mxu1 %v3169_v19  ;;  %2488 = vmatprep.subr.mxu0 %v2740_v0 }
 0x3ac   :  { %1509 = vmatprep.subr.mxu1 %v3174_v21  ;;  %2489 = vmatpush3.msra.mxu0 %v1579_v20  ;;  %v1875_v20 = vld [vmem:[#allocation5 + $0x110] sm:$0xff] }
 0x3ad   :  { %1510 = vmatpush1.msra.mxu1 %v3179_v22  ;;  %2490 = vmatprep.subr.mxu0 %v2740_v0 }
 0x3ae   :  { %2228 = vmatmul.mubr.msk.f32.vlgmr.msra.gmra.mxu1 %vm601_vm4, %v1392_v5  ;;  %2513 = vmatprep.subr.mxu1 %v2740_v0  ;;  %v1968_v5 = vld [vmem:[#allocation5 + $0x1b0] sm:$0xff] }
 0x3af   :  { %2491 = vmatpush3.msra.mxu0 %v1578_v23  ;;  %2514 = vmatpush3.msra.mxu1 %v1566_v24  ;;  %v1962_v23 = vld [vmem:[#allocation5 + $0x180] sm:$0xff] }
 0x3b0   :  { %2492 = vmatprep.subr.mxu0 %v2740_v0  ;;  %2515 = vmatprep.subr.mxu1 %v2740_v0  ;;  %v1873_v24 = vld [vmem:[#allocation5 + $0x100] sm:$0xff] }
 0x3b1   :  { %2493 = vmatpush3.msra.mxu0 %v1577_v25  ;;  %2516 = vmatpush3.msra.mxu1 %v1565_v26 }
 0x3b2   :  { %2494 = vmatprep.subr.mxu0 %v2740_v0  ;;  %2517 = vmatprep.subr.mxu1 %v2740_v0 }
 0x3b3   :  { %2495 = vmatpush3.msra.mxu0 %v1576_v27  ;;  %2518 = vmatpush3.msra.mxu1 %v1564_v28 }
 0x3b4   :  { %2496 = vmatprep.subr.mxu0 %v2740_v0  ;;  %2519 = vmatprep.subr.mxu1 %v2740_v0 }
 0x3b5   :  { %2497 = vmatpush3.msra.mxu0 %v1575_v29  ;;  %2520 = vmatpush3.msra.mxu1 %v1563_v30 }
 0x3b6   :  { %2498 = vmatprep.subr.mxu0 %v2740_v0  ;;  %2521 = vmatprep.subr.mxu1 %v2740_v0 }
 0x3b7   :  { %2499 = vmatpush3.msra.mxu0 %v1574_v31  ;;  %2522 = vmatpush3.msra.mxu1 %v1562_v32 }
 0x3b8   :  { %2500 = vmatprep.subr.mxu0 %v2740_v0  ;;  %2523 = vmatprep.subr.mxu1 %v2740_v0 }
 0x3b9   :  { %2501 = vmatpush3.msra.mxu0 %v1573_v33  ;;  %2524 = vmatpush3.msra.mxu1 %v1561_v34 }
 0x3ba   :  { %2502 = vmatprep.subr.mxu0 %v2740_v0  ;;  %2525 = vmatprep.subr.mxu1 %v2740_v0 }
 0x3bb   :  { %2503 = vmatpush3.msra.mxu0 %v1572_v35  ;;  %2526 = vmatpush3.msra.mxu1 %v1560_v36  ;;  %v2073_v36 = vld [vmem:[%s3355_s7 + $0x78] sm:$0xff] }
 0x3bc   :  { %2504 = vmatprep.subr.mxu0 %v2740_v0  ;;  %2527 = vmatprep.subr.mxu1 %v2740_v0 }
 0x3bd   :  { %2505 = vmatpush3.msra.mxu0 %v1571_v37  ;;  %2528 = vmatpush3.msra.mxu1 %v1559_v38  ;;  %v2072_v37 = vld [vmem:[%s3355_s7 + $0x70] sm:$0xff]  ;;  %v2071_v38 = vld [vmem:[%s3355_s7 + $0x68] sm:$0xff] }
 0x3be   :  { %2506 = vmatprep.subr.mxu0 %v2740_v0  ;;  %2529 = vmatprep.subr.mxu1 %v2740_v0 }
 0x3bf   :  { %2507 = vmatpush3.msra.mxu0 %v1570_v39  ;;  %2530 = vmatpush3.msra.mxu1 %v1558_v40  ;;  %v2070_v39 = vld [vmem:[%s3355_s7 + $0x60] sm:$0xff]  ;;  %v2069_v40 = vld [vmem:[%s3355_s7 + $0x58] sm:$0xff] }
 0x3c0   :  { %2508 = vmatprep.subr.mxu0 %v2740_v0  ;;  %2531 = vmatprep.subr.mxu1 %v2740_v0 }
 0x3c1   :  { %2509 = vmatpush3.msra.mxu0 %v1569_v41  ;;  %2532 = vmatpush3.msra.mxu1 %v1557_v42  ;;  %v2068_v41 = vld [vmem:[%s3355_s7 + $0x50] sm:$0xff]  ;;  %v2067_v42 = vld [vmem:[%s3355_s7 + $0x48] sm:$0xff] }
 0x3c2   :  { %2533 = vmatprep.subr.mxu1 %v2740_v0  ;;  %2229 = vmatprep.subr.msk.mxu0 %vm611_vm3, %v3129_v56 }
 0x3c3   :  { %2534 = vmatpush3.msra.mxu1 %v1556_v43  ;;  %2545 = vmatprep.mubr.msk.f32.mxu1 %vm2741_vm0, %v2740_v0  ;;  %v2066_v43 = vld [vmem:[%s3355_s7 + $0x40] sm:$0xff] }
 0x3c4   :  { %2535 = vmatprep.subr.mxu1 %v2740_v0 }
 0x3c5   :  { %2536 = vmatpush3.msra.mxu1 %v1555_v58  ;;  %v2065_v58 = vld [vmem:[%s3355_s7 + $0x38] sm:$0xff] }
 0x3c6   :  { %2537 = vmatprep.subr.mxu1 %v2740_v0 }
 0x3c7   :  { %2538 = vmatpush3.msra.mxu1 %v1554_v45  ;;  %v2064_v45 = vld [vmem:[%s3355_s7 + $0x30] sm:$0xff] }
 0x3c8   :  { %2539 = vmatprep.subr.mxu1 %v2740_v0 }
 0x3c9   :  { %2540 = vmatpush3.msra.mxu1 %v1553_v47  ;;  %v2063_v47 = vld [vmem:[%s3355_s7 + $0x28] sm:$0xff] }
 0x3ca   :  { %2541 = vmatprep.subr.mxu1 %v2740_v0 }
 0x3cb   :  { %2542 = vmatpush3.msra.mxu1 %v1552_v46  ;;  %v2062_v46 = vld [vmem:[%s3355_s7 + $0x20] sm:$0xff] }
 0x3cc   :  { %2543 = vmatprep.subr.mxu1 %v2740_v0 }
 0x3cd   :  { %2544 = vmatpush3.msra.mxu1 %v1551_v48  ;;  %v2061_v48 = vld [vmem:[%s3355_s7 + $0x18] sm:$0xff] }
 0x3ce   :  { %2232 = vmatprep.subr.msk.mxu1 %vm611_vm3, %v3160_v15  ;;  %v1966_v15 = vld [vmem:[#allocation5 + $0x1a0] sm:$0xff] }
 0x461   :  { %v1474_v44 = vpop.f32.mrf.mxu0 }
 0x463   :  { %v1476_v49 = vpop.f32.mrf.mxu0 }
 0x464   :  { %v1550_v57 = vmax.f32 %v1474_v44, %v1476_v49  ;;  %v2060_v44 = vld [vmem:[%s3355_s7 + $0x10] sm:$0xff]  ;;  %v2059_v49 = vld [vmem:[%s3355_s7 + $0x8] sm:$0xff] }
 0x466   :  { %2546 = vmatmul.mubr.f32.vlgmr.msra.gmra.mxu1 %v1550_v57  ;;  %v2058_v57 = vld [vmem:[%s3355_s7] sm:$0xff]  ;;  %s2158_s7 = sshll.u32 %s2742_s30, 4  ;;  %s2159_s7 = int_to_ptr.vmem [resolvable:$true] %s2158_s7 }
 0x467   :  { %2233 = vmatpush1.msk.msra.mxu1 %vm611_vm3, %v3162_v16  ;;  %1864 = vmatprep.mubr.f32.mxu1 %v2740_v0  ;;  %v1877_v16 = vld [vmem:[#allocation5 + $0x120] sm:$0xff]  ;;  %s2708_s13 = scalar_lea.vmem %s2159_s7, 32  ;;  %p2713_p11 = scmp.lt.s32.totalorder %s2159_s7, %s2159_s7 }
 0x468   :  { %1828 = vmatprep.subr.mxu1 %v3165_v18  ;;  %v1876_v18 = vld [vmem:[#allocation5 + $0x118] sm:$0xff]  ;;  %p2709_p10 = scmp.ne.s32.totalorder %s2159_s7, %s2708_s13  ;;  %p2714_p12 = scmp.lt.s32.totalorder %s2708_s13, %s2708_s13 }
 0x469   :  { %1829 = vmatpush1.msra.mxu1 %v3169_v19  ;;  %v1964_v19 = vld [vmem:[#allocation5 + $0x190] sm:$0xff] }
 0x46a   :  { %1830 = vmatprep.subr.mxu1 %v3174_v21  ;;  %v1963_v21 = vld [vmem:[#allocation5 + $0x188] sm:$0xff]  ;;  %p2715_p13 = por %p2714_p12, %p2713_p11 }
 0x46b   :  { %1831 = vmatpush1.msra.mxu1 %v3179_v22  ;;  %v1874_v22 = vld [vmem:[#allocation5 + $0x108] sm:$0xff] }
 0x46c   :  { %2234 = vmatmul.mubr.msk.f32.vlgmr.msra.gmra.mxu1 %vm601_vm4, %v1725_v50  ;;  %2583 = vmatprep.subr.mxu1 %v2740_v0  ;;  %p2716_p0 = pnand %p2715_p13, %p2709_p10 }
 0x46d   :  { %2584 = vmatpush3.msra.mxu1 %v1977_v51  ;;  %2615 = vmatprep.mubr.msk.f32.mxu1 %vm2741_vm0, %v2740_v0 }
 0x46e   :  { %v1545_v53 = vpop.f32.mrf.mxu1  ;;  %2585 = vmatprep.subr.mxu1 %v2740_v0 }
 0x46f   :  { %2586 = vmatpush3.msra.mxu1 %v1976_v52 }
 0x470   :  { %v1547_v55 = vpop.f32.mrf.mxu1  ;;  %2587 = vmatprep.subr.mxu1 %v2740_v0 }
 0x471   :  { %v1567_v56 = vmax.f32 %v1545_v53, %v1547_v55  ;;  %2588 = vmatpush3.msra.mxu1 %v1975_v54  ;;  %v2235_v54 = vld [vmem:[%s3354_s6] ss:$0 sm:$0xff] }
 0x472   :  { %2589 = vmatprep.subr.mxu1 %v2740_v0 }
 0x473   :  { %2511 = vmatmul.mubr.f32.vlgmr.msra.gmra.mxu0 %v1567_v56  ;;  %2590 = vmatpush3.msra.mxu1 %v1974_v60 }
 0x474   :  { %2230 = vmatpush1.msk.msra.mxu0 %vm611_vm3, %v3131_v61  ;;  %1793 = vmatprep.mubr.f32.mxu0 %v2740_v0  ;;  %v1887_v61 = vld [vmem:[#allocation5 + $0x170] sm:$0xff] }
 0x475   :  { %1757 = vmatprep.subr.mxu0 %v3137_v62  ;;  %2591 = vmatprep.subr.mxu1 %v2740_v0  ;;  %v1970_v62 = vld [vmem:[#allocation5 + $0x1c0] sm:$0xff] }
 0x476   :  { %1758 = vmatpush1.msra.mxu0 %v3139_v63  ;;  %2592 = vmatpush3.msra.mxu1 %v1973_v59  ;;  %v1886_v63 = vld [vmem:[#allocation5 + $0x168] sm:$0xff] }
 0x477   :  { %1759 = vmatprep.subr.mxu0 %v3141_v2  ;;  %2593 = vmatprep.subr.mxu1 %v2740_v0  ;;  %v1969_v2 = vld [vmem:[#allocation5 + $0x1b8] sm:$0xff] }
 0x478   :  { %1760 = vmatpush1.msra.mxu0 %v3144_v4  ;;  %2594 = vmatpush3.msra.mxu1 %v1972_v1  ;;  %v1885_v4 = vld [vmem:[#allocation5 + $0x160] sm:$0xff] }
 0x479   :  { %2231 = vmatmul.mubr.msk.f32.vlgmr.msra.gmra.mxu0 %vm601_vm4, %v1725_v50  ;;  %2548 = vmatprep.subr.mxu0 %v2740_v0 }
 0x47a   :  { %2549 = vmatpush3.msra.mxu0 %v1888_v6  ;;  %2595 = vmatprep.subr.mxu1 %v2740_v0 }
 0x47b   :  { %2550 = vmatprep.subr.mxu0 %v2740_v0  ;;  %2596 = vmatpush3.msra.mxu1 %v1971_v3 }
 0x47c   :  { %2551 = vmatpush3.msra.mxu0 %v1887_v61  ;;  %2597 = vmatprep.subr.mxu1 %v2740_v0 }
 0x47d   :  { %2552 = vmatprep.subr.mxu0 %v2740_v0  ;;  %2598 = vmatpush3.msra.mxu1 %v1970_v62 }
 0x47e   :  { %2553 = vmatpush3.msra.mxu0 %v1886_v63  ;;  %2599 = vmatprep.subr.mxu1 %v2740_v0 }
 0x47f   :  { %2554 = vmatprep.subr.mxu0 %v2740_v0  ;;  %2600 = vmatpush3.msra.mxu1 %v1969_v2 }
 0x480   :  { %2555 = vmatpush3.msra.mxu0 %v1885_v4  ;;  %2601 = vmatprep.subr.mxu1 %v2740_v0 }
 0x481   :  { %2556 = vmatprep.subr.mxu0 %v2740_v0  ;;  %2602 = vmatpush3.msra.mxu1 %v1968_v5 }
 0x482   :  { %2557 = vmatpush3.msra.mxu0 %v1884_v7  ;;  %2603 = vmatprep.subr.mxu1 %v2740_v0 }
 0x483   :  { %2558 = vmatprep.subr.mxu0 %v2740_v0  ;;  %2580 = vmatprep.mubr.msk.f32.mxu0 %vm2741_vm0, %v2740_v0 }
 0x484   :  { %2559 = vmatpush3.msra.mxu0 %v1883_v8  ;;  %2604 = vmatpush3.msra.mxu1 %v1967_v14 }
 0x485   :  { %2560 = vmatprep.subr.mxu0 %v2740_v0  ;;  %2605 = vmatprep.subr.mxu1 %v2740_v0 }
 0x486   :  { %2561 = vmatpush3.msra.mxu0 %v1882_v9  ;;  %2606 = vmatpush3.msra.mxu1 %v1966_v15 }
 0x487   :  { %2562 = vmatprep.subr.mxu0 %v2740_v0  ;;  %2607 = vmatprep.subr.mxu1 %v2740_v0 }
 0x488   :  { %2563 = vmatpush3.msra.mxu0 %v1881_v10  ;;  %2608 = vmatpush3.msra.mxu1 %v1965_v17 }
 0x489   :  { %2564 = vmatprep.subr.mxu0 %v2740_v0  ;;  %2609 = vmatprep.subr.mxu1 %v2740_v0 }
 0x48a   :  { %2565 = vmatpush3.msra.mxu0 %v1880_v11  ;;  %2610 = vmatpush3.msra.mxu1 %v1964_v19 }
 0x48b   :  { %2566 = vmatprep.subr.mxu0 %v2740_v0  ;;  %2611 = vmatprep.subr.mxu1 %v2740_v0 }
 0x48c   :  { %2567 = vmatpush3.msra.mxu0 %v1879_v12  ;;  %2612 = vmatpush3.msra.mxu1 %v1963_v21 }
 0x48d   :  { %2568 = vmatprep.subr.mxu0 %v2740_v0  ;;  %2613 = vmatprep.subr.mxu1 %v2740_v0 }
 0x48e   :  { %2569 = vmatpush3.msra.mxu0 %v1878_v13  ;;  %2614 = vmatpush3.msra.mxu1 %v1962_v23 }
 0x48f   :  { %2570 = vmatprep.subr.mxu0 %v2740_v0 }
 0x490   :  { %2571 = vmatpush3.msra.mxu0 %v1877_v16 }
 0x491   :  { %2572 = vmatprep.subr.mxu0 %v2740_v0 }
 0x492   :  { %2573 = vmatpush3.msra.mxu0 %v1876_v18 }
 0x493   :  { %2574 = vmatprep.subr.mxu0 %v2740_v0 }
 0x494   :  { %2575 = vmatpush3.msra.mxu0 %v1875_v20 }
 0x495   :  { %2576 = vmatprep.subr.mxu0 %v2740_v0 }
 0x496   :  { %2577 = vmatpush3.msra.mxu0 %v1874_v22 }
 0x497   :  { %2578 = vmatprep.subr.mxu0 %v2740_v0 }
 0x498   :  { %2579 = vmatpush3.msra.mxu0 %v1873_v24 }
 0x499   :  { %2618 = vmatprep.subr.mxu0 %v2740_v0 }
 0x526   :  { %v1721_v25 = vpop.f32.mrf.mxu1 }
 0x528   :  { %v2547_v26 = vpop.f32.mrf.mxu1 }
 0x52c   :  { %v1866_v27 = vpop.f32.mrf.mxu1 }
 0x52e   :  { %v1868_v28 = vpop.f32.mrf.mxu1 }
 0x52f   :  { %v1960_v29 = vmax.f32 %v1866_v27, %v1868_v28 }
 0x531   :  { %2616 = vmatmul.mubr.f32.vlgmr.msra.gmra.mxu1 %v1960_v29 }
 0x533   :  { %v1651_v30 = vpop.f32.mrf.mxu0 }
 0x534   :  { %v1722_v31 = vadd.f32 %v1721_v25, %v1651_v30 }
 0x535   :  { %v2512_v32 = vpop.f32.mrf.mxu0 }
 0x539   :  { %v1795_v33 = vpop.f32.mrf.mxu0 }
 0x53b   :  { %v1797_v34 = vpop.f32.mrf.mxu0 }
 0x53c   :  { %v1871_v35 = vmax.f32 %v1795_v33, %v1797_v34 }
 0x53e   :  { %2581 = vmatmul.mubr.f32.vlgmr.msra.gmra.mxu0 %v1871_v35 }
 0x53f   :  { %2619 = vmatpush3.msra.mxu0 %v2073_v36  ;;  %2650 = vmatprep.mubr.msk.f32.mxu0 %vm2741_vm0, %v2740_v0 }
 0x540   :  { %2620 = vmatprep.subr.mxu0 %v2740_v0 }
 0x541   :  { %2621 = vmatpush3.msra.mxu0 %v2072_v37 }
 0x542   :  { %2622 = vmatprep.subr.mxu0 %v2740_v0 }
 0x543   :  { %2623 = vmatpush3.msra.mxu0 %v2071_v38 }
 0x544   :  { %2624 = vmatprep.subr.mxu0 %v2740_v0 }
 0x545   :  { %2625 = vmatpush3.msra.mxu0 %v2070_v39 }
 0x546   :  { %2626 = vmatprep.subr.mxu0 %v2740_v0 }
 0x547   :  { %2627 = vmatpush3.msra.mxu0 %v2069_v40 }
 0x548   :  { %2628 = vmatprep.subr.mxu0 %v2740_v0 }
 0x549   :  { %2629 = vmatpush3.msra.mxu0 %v2068_v41 }
 0x54a   :  { %2630 = vmatprep.subr.mxu0 %v2740_v0 }
 0x54b   :  { %2631 = vmatpush3.msra.mxu0 %v2067_v42 }
 0x54c   :  { %2632 = vmatprep.subr.mxu0 %v2740_v0 }
 0x54d   :  { %2633 = vmatpush3.msra.mxu0 %v2066_v43 }
 0x54e   :  { %2634 = vmatprep.subr.mxu0 %v2740_v0 }
 0x54f   :  { %2635 = vmatpush3.msra.mxu0 %v2065_v58 }
 0x550   :  { %2636 = vmatprep.subr.mxu0 %v2740_v0 }
 0x551   :  { %2637 = vmatpush3.msra.mxu0 %v2064_v45 }
 0x552   :  { %2638 = vmatprep.subr.mxu0 %v2740_v0 }
 0x553   :  { %2639 = vmatpush3.msra.mxu0 %v2063_v47 }
 0x554   :  { %2640 = vmatprep.subr.mxu0 %v2740_v0 }
 0x555   :  { %2641 = vmatpush3.msra.mxu0 %v2062_v46 }
 0x556   :  { %2642 = vmatprep.subr.mxu0 %v2740_v0 }
 0x557   :  { %2643 = vmatpush3.msra.mxu0 %v2061_v48 }
 0x558   :  { %2644 = vmatprep.subr.mxu0 %v2740_v0 }
 0x559   :  { %2645 = vmatpush3.msra.mxu0 %v2060_v44 }
 0x55a   :  { %2646 = vmatprep.subr.mxu0 %v2740_v0 }
 0x55b   :  { %2647 = vmatpush3.msra.mxu0 %v2059_v49 }
 0x55c   :  { %2648 = vmatprep.subr.mxu0 %v2740_v0  ;;  %v2236_v0 = vld [vmem:[%s3356_s8] ss:$0 sm:$0xff] }
 0x55d   :  { %2649 = vmatpush3.msra.mxu0 %v2058_v57 }
 0x5f1   :  { %v2044_v50 = vpop.f32.mrf.mxu1 }
 0x5f3   :  { %v2617_v51 = vpop.f32.mrf.mxu1 }
 0x5fe   :  { %v1955_v52 = vpop.f32.mrf.mxu0 }
 0x5ff   :  { %v1959_v53 = vadd.f32 %v1955_v52, %v1722_v31 }
 0x600   :  { %v2582_v55 = vpop.f32.mrf.mxu0 }
 0x601   :  { %v2048_v60 = vadd.f32 %v2044_v50, %v1959_v53 }
 0x603   :  { %v2056_v56 = vadd.f32 %v2235_v54, %v2048_v60 }
 0x605   :  { %v2057_v59 = vmax.f32 %v2056_v56, 0.0 }
 0x607   :  { %2651 = vmatmul.mubr.f32.vlgmr.msra.gmra.mxu0 %v2057_v59 }
 0x6c7   :  { %v2147_v1 = vpop.f32.mrf.mxu0 }
 0x6c8   :  { %v2148_v6 = vadd.f32 %v2236_v0, %v2147_v1 }
 0x6c9   :  { %v2652_v3 = vpop.f32.mrf.mxu0 }
 0x6ca   :  { %2151 = vst [vmem:[#allocation7] sm:$0x3] %v2148_v6 }
 0x6cb   :  { %2719 = shalt.err (!%p2716_p0)
}
 0x6cc   :  { %2161 = dma.vmem_to_hbm [thread:$0]  %s2159_s7, 32, %s3360_s12, [#allocation4]  }
 0x6cd   :  { %2732 = dma.done.wait [#allocation4], 32  }
 0x6ce   :  { %2733 = vsyncadd [#allocation4], 4294967264 }
 0x6cf   :  { %2165 = vsyncpa [#allocation3], 1 }
 0x6d0   :  { %2166 = vsyncpa [#allocation6], 1 }
 0x6d1   :  { %2167 = vsyncpa [#allocation4], 1 }

</bundles_post_ra>
